<compile_context>
chip_gen: v7x
topology: tpu7x:2x2x1
jax: 0.10.0
libtpu: 0.0.40
codegen_flags: <defaults>
</compile_context>

<pallas_src>
import functools

import jax
import jax.numpy as jnp
from jax.experimental import pallas as pl
from jax.experimental.pallas import tpu as pltpu


def _round_up(n, m):
    return -(-n // m) * m


# --------------------------------------------------------------------------- #
# Kernel
# --------------------------------------------------------------------------- #
def coupling_fused_kernel(x_ref, w_ref, a_ref, y_ref, ld_ref, *, PC):
    """One batch tile of the fused coupling forward.

    w_ref : (5*PC, PC) matmul-dtype weights, stacked [W1, W2, W3, W4t, W4s],
            every segment 128-row aligned and zero-padded to PC lanes.
    a_ref : (8, PC) f32 aux rows: b1, b2, b3, b4t, b4s, mask, inv_mask, relu_sel.
    """
    f32 = jnp.float32
    mmdt = w_ref.dtype                       # MXU operand dtype (bf16 or f32)

    x = x_ref[...].astype(f32)               # (TM, PC), lanes >= D are zero

    b1 = a_ref[0:1, :]
    b2 = a_ref[1:2, :]
    b3 = a_ref[2:3, :]
    b4t = a_ref[3:4, :]
    b4s = a_ref[4:5, :]
    mask = a_ref[5:6, :]
    imask = a_ref[6:7, :]
    relu_sel = a_ref[7:8, :] > 0.5           # lanes [0:H] -> ReLU, else tanh

    def W(i):                                # static (PC, PC) weight slab
        return w_ref[i * PC:(i + 1) * PC, :]

    def act(h):                              # f32 in / f32 out
        return jnp.where(relu_sel, jnp.maximum(h, 0.0), jnp.tanh(h))

    xm = (x * mask).astype(mmdt)             # (TM, PC)

    h = jnp.dot(xm, W(0), preferred_element_type=f32) + b1
    h = act(h).astype(mmdt)
    h = jnp.dot(h, W(1), preferred_element_type=f32) + b2
    h = act(h).astype(mmdt)
    h = jnp.dot(h, W(2), preferred_element_type=f32) + b3
    h = act(h).astype(mmdt)

    t_raw = jnp.dot(h, W(3), preferred_element_type=f32) + b4t   # translate out
    s_raw = jnp.dot(h, W(4), preferred_element_type=f32) + b4s   # scale out

    t = t_raw * imask                        # padded lanes -> 0
    log_s = s_raw * imask                    # padded lanes -> 0

    y_ref[...] = (x * jnp.exp(log_s) + t).astype(y_ref.dtype)
    ld_ref[...] = jnp.sum(log_s, axis=-1, keepdims=True)


# --------------------------------------------------------------------------- #
# Parameter fusion + packing (done once, outside the kernel)
# --------------------------------------------------------------------------- #
def _pack_params(t_params, s_params, mask, D, H, dtype):
    """Fuse translate/scale nets into lane-aligned (PC, PC) weight slabs."""
    H2 = 2 * H
    PC = _round_up(max(H2, D, 8), 128)       # lane / contraction width
    assert H2 <= PC and D <= PC

    (tW1, tb1), (tW2, tb2), (tW3, tb3), (tW4, tb4) = t_params
    (sW1, sb1), (sW2, sb2), (sW3, sb3), (sW4, sb4) = s_params

    f32 = jnp.float32

    # Layer 1: lanes [0:H] = translate, [H:2H] = scale.
    W1 = jnp.zeros((PC, PC), f32)
    W1 = W1.at[:D, :H].set(tW1.astype(f32)).at[:D, H:H2].set(sW1.astype(f32))

    # Hidden layers: block-diagonal so the two nets never mix.
    def bdiag(tw, sw):
        w = jnp.zeros((PC, PC), f32)
        return w.at[:H, :H].set(tw.astype(f32)).at[H:H2, H:H2].set(sw.astype(f32))

    W2 = bdiag(tW2, sW2)
    W3 = bdiag(tW3, sW3)

    # Output layer split into two slabs so t and log_s each land in their own
    # 128-aligned lane block (lanes [0:D] of separate (TM, PC) results).
    W4t = jnp.zeros((PC, PC), f32).at[:H, :D].set(tW4.astype(f32))
    W4s = jnp.zeros((PC, PC), f32).at[H:H2, :D].set(sW4.astype(f32))

    w_packed = jnp.concatenate([W1, W2, W3, W4t, W4s], axis=0).astype(dtype)

    def row(vals, n):
        r = jnp.zeros((1, PC), f32)
        return r.at[0, :n].set(vals.astype(f32))

    mask = mask.reshape(-1).astype(f32)
    aux = jnp.concatenate([
        row(jnp.concatenate([tb1, sb1]), H2),      # b1
        row(jnp.concatenate([tb2, sb2]), H2),      # b2
        row(jnp.concatenate([tb3, sb3]), H2),      # b3
        row(tb4, D),                               # b4 (translate)
        row(sb4, D),                               # b4 (scale)
        row(mask, D),                              # mask
        row(1.0 - mask, D),                        # inv mask (padded lanes = 0)
        row(jnp.ones((H,), f32), H),               # relu-lane selector
    ], axis=0)                                     # (8, PC) f32

    return w_packed, aux, PC


# --------------------------------------------------------------------------- #
# Wrapper
# --------------------------------------------------------------------------- #
def coupling_layer_forward(x, mask, t_params, s_params, *,
                           tile_m=2048, matmul_dtype=jnp.bfloat16):
    """x: (B, D) f32; mask: (D,) f32; {t,s}_params: 4 x (W [in,out], b [out])."""
    B, D = x.shape
    H = t_params[0][0].shape[1]
    w_packed, aux, PC = _pack_params(t_params, s_params, mask, D, H, matmul_dtype)

    # Batch tile: as fat as reasonable, but keep >= 2 tiles for v7x megacore
    # once the batch is big enough to split.
    Bp8 = _round_up(B, 8)
    TM = min(tile_m, Bp8)
    if TM == Bp8 and Bp8 >= 1024:
        TM = _round_up((Bp8 + 1) // 2, 8)
    Bp = _round_up(B, TM)

    # Lane-dense, zero-padded activations (padded lanes/rows stay exactly 0).
    x_pad = jnp.zeros((Bp, PC), x.dtype).at[:B, :D].set(x)

    kernel = functools.partial(coupling_fused_kernel, PC=PC)

    itemsize = jnp.dtype(x.dtype).itemsize
    cost = pl.CostEstimate(
        flops=2 * 5 * Bp * PC * PC,
        transcendentals=4 * Bp * PC,                   # 3x tanh + 1x exp per row
        bytes_accessed=(2 * Bp * PC * itemsize          # x in + y out
                        + w_packed.size * jnp.dtype(matmul_dtype).itemsize
                        + aux.size * 4 + Bp * 4),
    )

    y, ld = pl.pallas_call(
        kernel,
        grid=(Bp // TM,),
        in_specs=[
            pl.BlockSpec((TM, PC), lambda i: (i, 0)),      # batch-tiled activations
            pl.BlockSpec((5 * PC, PC), lambda i: (0, 0)),  # packed weights, resident
            pl.BlockSpec((8, PC), lambda i: (0, 0)),       # f32 biases/masks/selector
        ],
        out_specs=[
            pl.BlockSpec((TM, PC), lambda i: (i, 0)),
            pl.BlockSpec((TM, 1), lambda i: (i, 0)),
        ],
        out_shape=(
            jax.ShapeDtypeStruct((Bp, PC), x.dtype),
            jax.ShapeDtypeStruct((Bp, 1), jnp.float32),
        ),
        compiler_params=pltpu.CompilerParams(
            dimension_semantics=("parallel",),   # shard batch tiles across TCs
            vmem_limit_bytes=48 * 1024 * 1024,   # > default caps, < v7x 64 MiB
        ),
        cost_estimate=cost,
    )(x_pad, w_packed, aux)
    return y[:B, :D], ld[:B, 0]


# --------------------------------------------------------------------------- #
# Reference + test harness
# --------------------------------------------------------------------------- #
def make_mlp_params(key, num_inputs, num_hidden, num_layers=2):
    """Linear params, weights stored [in, out] (x @ W + b), orthogonal-ish init."""
    dims = [num_inputs] + [num_hidden] * (num_layers + 1) + [num_inputs]
    params = []
    for d_in, d_out in zip(dims[:-1], dims[1:]):
        key, kw, kb = jax.random.split(key, 3)
        a = jax.random.normal(kw, (max(d_in, d_out), max(d_in, d_out)), jnp.float32)
        q, _ = jnp.linalg.qr(a)
        W = q[:d_in, :d_out].astype(jnp.float32)
        b = 0.1 * jax.random.normal(kb, (d_out,), jnp.float32)
        params.append((W, b))
    return params, key


def reference_forward(x, mask, t_params, s_params):
    xm = x * mask
    h = xm
    for i, (W, b) in enumerate(t_params):
        h = h @ W + b
        if i < len(t_params) - 1:
            h = jnp.maximum(h, 0.0)
    t = h * (1.0 - mask)
    g = xm
    for i, (W, b) in enumerate(s_params):
        g = g @ W + b
        if i < len(s_params) - 1:
            g = jnp.tanh(g)
    log_s = g * (1.0 - mask)
    return x * jnp.exp(log_s) + t, log_s.sum(-1)


if __name__ == "__main__":
    B, D, H = 256, 8, 32          # batch, num_inputs, num_hidden

    key = jax.random.PRNGKey(0)
    key, kx = jax.random.split(key)
    x = jax.random.normal(kx, (B, D), jnp.float32)
    mask = jnp.array([1.0, 0.0] * (D // 2), jnp.float32)   # alternating RealNVP mask

    t_params, key = make_mlp_params(key, D, H, num_layers=2)
    s_params, key = make_mlp_params(key, D, H, num_layers=2)

    y_ref, ld_ref = reference_forward(x, mask, t_params, s_params)

    # Exact-precision mode (f32 MXU operands): tight check of the fused kernel.
    y32, ld32 = coupling_layer_forward(x, mask, t_params, s_params,
                                       matmul_dtype=jnp.float32)
    jax.block_until_ready((y32, ld32))
    assert jnp.allclose(y32, y_ref, atol=1e-4, rtol=1e-4)
    assert jnp.allclose(ld32, ld_ref, atol=1e-4, rtol=1e-4)

    # Throughput mode (bf16 MXU operands, f32 biases / accumulation / activations).
    y16, ld16 = coupling_layer_forward(x, mask, t_params, s_params,
                                       matmul_dtype=jnp.bfloat16)
    jax.block_until_ready((y16, ld16))
    assert jnp.allclose(y16, y_ref, atol=2e-1, rtol=2e-1)
    assert jnp.allclose(ld16, ld_ref, atol=2e-1, rtol=2e-1)

    print("KERNEL_OK")
</pallas_src>

<mosaic_0001>
module attributes {stable_mosaic.version = 11 : i64} {
  func.func @coupling_fused_kernel(%arg0: i32, %arg1: memref<256x128xf32, #tpu.memory_space<vmem>>, %arg2: memref<640x128xf32, #tpu.memory_space<vmem>>, %arg3: memref<8x128xf32, #tpu.memory_space<vmem>>, %arg4: memref<256x128xf32, #tpu.memory_space<vmem>>, %arg5: memref<256x1xf32, #tpu.memory_space<vmem>>) attributes {dimension_semantics = [#tpu.dimension_semantics<parallel>], iteration_bounds = array<i64: 1>, scalar_prefetch = 0 : i64, scratch_operands = 0 : i64, tpu.core_type = #tpu.core_type<tc>, window_params = [{transform_indices = @transform_0, window_bounds = array<i64: 256, 128>}, {pipeline_mode = #tpu.pipeline_mode<synchronous>, transform_indices = @transform_1, window_bounds = array<i64: 640, 128>}, {pipeline_mode = #tpu.pipeline_mode<synchronous>, transform_indices = @transform_2, window_bounds = array<i64: 8, 128>}, {transform_indices = @transform_3, window_bounds = array<i64: 256, 128>}, {transform_indices = @transform_4, window_bounds = array<i64: 256, 1>}]} {
    %c0 = arith.constant 0 : index
    %c0_0 = arith.constant 0 : index
    %0 = vector.load %arg1[%c0, %c0_0] : memref<256x128xf32, #tpu.memory_space<vmem>>, vector<256x128xf32>
    %c0_1 = arith.constant 0 : index
    %c0_2 = arith.constant 0 : index
    %1 = vector.load %arg3[%c0_1, %c0_2] : memref<8x128xf32, #tpu.memory_space<vmem>>, vector<1x128xf32>
    %c1 = arith.constant 1 : index
    %c0_3 = arith.constant 0 : index
    %2 = vector.load %arg3[%c1, %c0_3] : memref<8x128xf32, #tpu.memory_space<vmem>>, vector<1x128xf32>
    %c2 = arith.constant 2 : index
    %c0_4 = arith.constant 0 : index
    %3 = vector.load %arg3[%c2, %c0_4] : memref<8x128xf32, #tpu.memory_space<vmem>>, vector<1x128xf32>
    %c3 = arith.constant 3 : index
    %c0_5 = arith.constant 0 : index
    %4 = vector.load %arg3[%c3, %c0_5] : memref<8x128xf32, #tpu.memory_space<vmem>>, vector<1x128xf32>
    %c4 = arith.constant 4 : index
    %c0_6 = arith.constant 0 : index
    %5 = vector.load %arg3[%c4, %c0_6] : memref<8x128xf32, #tpu.memory_space<vmem>>, vector<1x128xf32>
    %c5 = arith.constant 5 : index
    %c0_7 = arith.constant 0 : index
    %6 = vector.load %arg3[%c5, %c0_7] : memref<8x128xf32, #tpu.memory_space<vmem>>, vector<1x128xf32>
    %c6 = arith.constant 6 : index
    %c0_8 = arith.constant 0 : index
    %7 = vector.load %arg3[%c6, %c0_8] : memref<8x128xf32, #tpu.memory_space<vmem>>, vector<1x128xf32>
    %c7 = arith.constant 7 : index
    %c0_9 = arith.constant 0 : index
    %8 = vector.load %arg3[%c7, %c0_9] : memref<8x128xf32, #tpu.memory_space<vmem>>, vector<1x128xf32>
    %cst = arith.constant 5.000000e-01 : f32
    %9 = vector.broadcast %cst : f32 to vector<1x128xf32>
    %10 = arith.cmpf ogt, %8, %9 : vector<1x128xf32>
    %11 = vector.broadcast %6 : vector<1x128xf32> to vector<256x128xf32>
    %12 = arith.mulf %0, %11 : vector<256x128xf32>
    %c0_10 = arith.constant 0 : index
    %c0_11 = arith.constant 0 : index
    %13 = vector.load %arg2[%c0_10, %c0_11] : memref<640x128xf32, #tpu.memory_space<vmem>>, vector<128x128xf32>
    %cst_12 = arith.constant dense<0.000000e+00> : vector<256x128xf32>
    %14 = tpu.matmul %12, %13, %cst_12 {dimension_numbers = #tpu.dot_dimension_numbers<[1], [0], [0], [1], [0, 0, 1, 1], [], []>} : vector<256x128xf32>, vector<128x128xf32>, vector<256x128xf32> -> vector<256x128xf32>
    %15 = vector.broadcast %1 : vector<1x128xf32> to vector<256x128xf32>
    %16 = arith.addf %14, %15 : vector<256x128xf32>
    %cst_13 = arith.constant 0.000000e+00 : f32
    %17 = vector.broadcast %cst_13 : f32 to vector<256x128xf32>
    %18 = arith.maximumf %16, %17 : vector<256x128xf32>
    %19 = math.tanh %16 : vector<256x128xf32>
    %20 = vector.shape_cast %10 : vector<1x128xi1> to vector<1x128xi1>
    %21 = vector.broadcast %20 : vector<1x128xi1> to vector<256x128xi1>
    %22 = arith.select %21, %18, %19 : vector<256x128xi1>, vector<256x128xf32>
    %c128 = arith.constant 128 : index
    %c0_14 = arith.constant 0 : index
    %23 = vector.load %arg2[%c128, %c0_14] : memref<640x128xf32, #tpu.memory_space<vmem>>, vector<128x128xf32>
    %cst_15 = arith.constant dense<0.000000e+00> : vector<256x128xf32>
    %24 = tpu.matmul %22, %23, %cst_15 {dimension_numbers = #tpu.dot_dimension_numbers<[1], [0], [0], [1], [0, 0, 1, 1], [], []>} : vector<256x128xf32>, vector<128x128xf32>, vector<256x128xf32> -> vector<256x128xf32>
    %25 = vector.broadcast %2 : vector<1x128xf32> to vector<256x128xf32>
    %26 = arith.addf %24, %25 : vector<256x128xf32>
    %cst_16 = arith.constant 0.000000e+00 : f32
    %27 = vector.broadcast %cst_16 : f32 to vector<256x128xf32>
    %28 = arith.maximumf %26, %27 : vector<256x128xf32>
    %29 = math.tanh %26 : vector<256x128xf32>
    %30 = vector.shape_cast %10 : vector<1x128xi1> to vector<1x128xi1>
    %31 = vector.broadcast %30 : vector<1x128xi1> to vector<256x128xi1>
    %32 = arith.select %31, %28, %29 : vector<256x128xi1>, vector<256x128xf32>
    %c256 = arith.constant 256 : index
    %c0_17 = arith.constant 0 : index
    %33 = vector.load %arg2[%c256, %c0_17] : memref<640x128xf32, #tpu.memory_space<vmem>>, vector<128x128xf32>
    %cst_18 = arith.constant dense<0.000000e+00> : vector<256x128xf32>
    %34 = tpu.matmul %32, %33, %cst_18 {dimension_numbers = #tpu.dot_dimension_numbers<[1], [0], [0], [1], [0, 0, 1, 1], [], []>} : vector<256x128xf32>, vector<128x128xf32>, vector<256x128xf32> -> vector<256x128xf32>
    %35 = vector.broadcast %3 : vector<1x128xf32> to vector<256x128xf32>
    %36 = arith.addf %34, %35 : vector<256x128xf32>
    %cst_19 = arith.constant 0.000000e+00 : f32
    %37 = vector.broadcast %cst_19 : f32 to vector<256x128xf32>
    %38 = arith.maximumf %36, %37 : vector<256x128xf32>
    %39 = math.tanh %36 : vector<256x128xf32>
    %40 = vector.shape_cast %10 : vector<1x128xi1> to vector<1x128xi1>
    %41 = vector.broadcast %40 : vector<1x128xi1> to vector<256x128xi1>
    %42 = arith.select %41, %38, %39 : vector<256x128xi1>, vector<256x128xf32>
    %c384 = arith.constant 384 : index
    %c0_20 = arith.constant 0 : index
    %43 = vector.load %arg2[%c384, %c0_20] : memref<640x128xf32, #tpu.memory_space<vmem>>, vector<128x128xf32>
    %cst_21 = arith.constant dense<0.000000e+00> : vector<256x128xf32>
    %44 = tpu.matmul %42, %43, %cst_21 {dimension_numbers = #tpu.dot_dimension_numbers<[1], [0], [0], [1], [0, 0, 1, 1], [], []>} : vector<256x128xf32>, vector<128x128xf32>, vector<256x128xf32> -> vector<256x128xf32>
    %45 = vector.broadcast %4 : vector<1x128xf32> to vector<256x128xf32>
    %46 = arith.addf %44, %45 : vector<256x128xf32>
    %c512 = arith.constant 512 : index
    %c0_22 = arith.constant 0 : index
    %47 = vector.load %arg2[%c512, %c0_22] : memref<640x128xf32, #tpu.memory_space<vmem>>, vector<128x128xf32>
    %cst_23 = arith.constant dense<0.000000e+00> : vector<256x128xf32>
    %48 = tpu.matmul %42, %47, %cst_23 {dimension_numbers = #tpu.dot_dimension_numbers<[1], [0], [0], [1], [0, 0, 1, 1], [], []>} : vector<256x128xf32>, vector<128x128xf32>, vector<256x128xf32> -> vector<256x128xf32>
    %49 = vector.broadcast %5 : vector<1x128xf32> to vector<256x128xf32>
    %50 = arith.addf %48, %49 : vector<256x128xf32>
    %51 = vector.broadcast %7 : vector<1x128xf32> to vector<256x128xf32>
    %52 = arith.mulf %46, %51 : vector<256x128xf32>
    %53 = vector.broadcast %7 : vector<1x128xf32> to vector<256x128xf32>
    %54 = arith.mulf %50, %53 : vector<256x128xf32>
    %55 = math.exp %54 : vector<256x128xf32>
    %56 = arith.mulf %0, %55 : vector<256x128xf32>
    %57 = arith.addf %56, %52 : vector<256x128xf32>
    %c0_24 = arith.constant 0 : index
    %c0_25 = arith.constant 0 : index
    %58 = vector.load %arg4[%c0_24, %c0_25] : memref<256x128xf32, #tpu.memory_space<vmem>>, vector<256x128xf32>
    tpu.vector_store %arg4[%c0_24, %c0_25], %57 {strides = array<i32>} : memref<256x128xf32, #tpu.memory_space<vmem>>, vector<256x128xf32>,
    %cst_26 = arith.constant dense<0.000000e+00> : vector<256xf32>
    %59 = vector.multi_reduction <add>, %54, %cst_26 [1] : vector<256x128xf32> to vector<256xf32>
    %60 = vector.shape_cast %59 : vector<256xf32> to vector<256x1xf32>
    %c0_27 = arith.constant 0 : index
    %c0_28 = arith.constant 0 : index
    %61 = vector.load %arg5[%c0_27, %c0_28] : memref<256x1xf32, #tpu.memory_space<vmem>>, vector<256x1xf32>
    tpu.vector_store %arg5[%c0_27, %c0_28], %60 {strides = array<i32>} : memref<256x1xf32, #tpu.memory_space<vmem>>, vector<256x1xf32>,
    return
  }
  func.func @transform_0(%arg0: i32) -> (i32, i32) {
    %c0_i32 = arith.constant 0 : i32
    %c0_i32_0 = arith.constant 0 : i32
    return %arg0, %c0_i32 : i32, i32
  }
  func.func @transform_1(%arg0: i32) -> (i32, i32) {
    %c0_i32 = arith.constant 0 : i32
    %c0_i32_0 = arith.constant 0 : i32
    %c0_i32_1 = arith.constant 0 : i32
    return %c0_i32, %c0_i32_0 : i32, i32
  }
  func.func @transform_2(%arg0: i32) -> (i32, i32) {
    %c0_i32 = arith.constant 0 : i32
    %c0_i32_0 = arith.constant 0 : i32
    %c0_i32_1 = arith.constant 0 : i32
    return %c0_i32, %c0_i32_0 : i32, i32
  }
  func.func @transform_3(%arg0: i32) -> (i32, i32) {
    %c0_i32 = arith.constant 0 : i32
    %c0_i32_0 = arith.constant 0 : i32
    return %arg0, %c0_i32 : i32, i32
  }
  func.func @transform_4(%arg0: i32) -> (i32, i32) {
    %c0_i32 = arith.constant 0 : i32
    %c0_i32_0 = arith.constant 0 : i32
    return %arg0, %c0_i32 : i32, i32
  }
}

</mosaic_0001>

<bundles_post_ra>
// kernel: tpu_custom_call.1
= control target key start
LH: loop header
LB: loop body
LE: loop exit
PB: predicated region body
PF: predicated region fallthrough
CT: control target
= control target key end

     0   :  { %10 = vsyncpa [#allocation3], 0  ;;  %s4089_s0 = inlined_call_operand.hbm [shape: f32[256,128], index: 0, kind: input, shape index: {}]   ;;  %s4090_s1 = inlined_call_operand.hbm [shape: f32[640,128], index: 1, kind: input, shape index: {}]   ;;  %s4091_s2 = inlined_call_operand.hbm [shape: f32[8,128], index: 2, kind: input, shape index: {}]   ;;  %s4092_s3 = inlined_call_operand.hbm [shape: f32[256,128], index: 3, kind: output, shape index: {0}]   ;;  %s4093_s4 = inlined_call_operand.vmem [shape: f32[256,1], index: 4, kind: output, shape index: {1}]  }
   0x1   :  { %11 = vsyncpa [#allocation6], 0 }
   0x2   :  { %12 = vsyncpa [#allocation4], 0  ;;  %s3211_s15 = smov [#allocation5]   ;;  %s3212_s17 = smov [#allocation2]  }
   0x3   :  { %s30_s16 = sshll.u32 %s3211_s15, 4  ;;  %s18_s18 = sshll.u32 %s3212_s17, 4  ;;  %s31_s16 = int_to_ptr.vmem [resolvable:$true] %s30_s16  ;;  %s3243_s18 = int_to_ptr.vmem [resolvable:$true] %s18_s18 }
   0x4   :  { %s3117_s21 = scalar_lea.hbm %s4090_s1, 10240 }
   0x5   :  { %p3118_p0 = scmp.ne.s32.totalorder %s4090_s1, %s3117_s21  ;;  %p3121_p1 = scmp.lt.u32.totalorder %s3117_s21, %s4090_s1 }
   0x7   :  { %p3123_p2 = pnand %p3121_p1, %p3118_p0 }
   0x9   :  { %3126 = shalt.err (!%p3123_p2)
}
   0xa   :  { %s3127_s26 = scalar_lea.vmem %s31_s16, 10240  ;;  %p3132_p4 = scmp.lt.s32.totalorder %s31_s16, %s31_s16 }
   0xb   :  { %p3128_p3 = scmp.ne.s32.totalorder %s31_s16, %s3127_s26  ;;  %p3133_p5 = scmp.lt.s32.totalorder %s3127_s26, %s3127_s26 }
   0xd   :  { %p3134_p6 = por %p3133_p5, %p3132_p4 }
   0xf   :  { %p3135_p7 = pnand %p3134_p6, %p3128_p3 }
  0x11   :  { %3138 = shalt.err (!%p3135_p7)
}
  0x12   :  { %s3213_s27 = smov 128   ;;  %s3214_s28 = smov 8  }
  0x13   :  { %36 = dma.hbm_to_vmem [thread:$0]  %s4090_s1, 10240, %s31_s16, [#allocation6], %s3213_s27, %s3213_s27, %s3214_s28  }
  0x14   :  { %s3139_s7 = scalar_lea.hbm %s4089_s0, 4096 }
  0x15   :  { %p3140_p8 = scmp.ne.s32.totalorder %s4089_s0, %s3139_s7  ;;  %p3143_p9 = scmp.lt.u32.totalorder %s3139_s7, %s4089_s0 }
  0x17   :  { %p3145_p10 = pnand %p3143_p9, %p3140_p8 }
  0x19   :  { %3148 = shalt.err (!%p3145_p10)
}
  0x1a   :  { %s3149_s12 = scalar_lea.vmem %s3243_s18, 4096  ;;  %p3154_p12 = scmp.lt.s32.totalorder %s3243_s18, %s3243_s18 }
  0x1b   :  { %p3150_p11 = scmp.ne.s32.totalorder %s3243_s18, %s3149_s12  ;;  %p3155_p13 = scmp.lt.s32.totalorder %s3149_s12, %s3149_s12 }
  0x1d   :  { %p3156_p0 = por %p3155_p13, %p3154_p12 }
  0x1f   :  { %p3157_p1 = pnand %p3156_p0, %p3150_p11 }
  0x21   :  { %3160 = shalt.err (!%p3157_p1)
}
  0x22   :  { %24 = dma.hbm_to_vmem [thread:$0]  %s4089_s0, 4096, %s3243_s18, [#allocation3], %s3213_s27, %s3213_s27, %s3214_s28  }
  0x23   :  { %s3215_s14 = smov [#allocation7]   ;;  %s3161_s19 = scalar_lea.hbm %s4091_s2, 128 }
  0x24   :  { %s43_s15 = sshll.u32 %s3215_s14, 4  ;;  %p3162_p2 = scmp.ne.s32.totalorder %s4091_s2, %s3161_s19  ;;  %s44_s15 = int_to_ptr.vmem [resolvable:$true] %s43_s15 }
  0x25   :  { %p3165_p3 = scmp.lt.u32.totalorder %s3161_s19, %s4091_s2 }
  0x27   :  { %p3167_p4 = pnand %p3165_p3, %p3162_p2 }
  0x29   :  { %3170 = shalt.err (!%p3167_p4)
}
  0x2a   :  { %s3171_s24 = scalar_lea.vmem %s44_s15, 128  ;;  %p3176_p6 = scmp.lt.s32.totalorder %s44_s15, %s44_s15 }
  0x2b   :  { %p3172_p5 = scmp.ne.s32.totalorder %s44_s15, %s3171_s24  ;;  %p3177_p7 = scmp.lt.s32.totalorder %s3171_s24, %s3171_s24 }
  0x2d   :  { %p3178_p8 = por %p3177_p7, %p3176_p6 }
  0x2f   :  { %p3179_p9 = pnand %p3178_p8, %p3172_p5 }
  0x31   :  { %3182 = shalt.err (!%p3179_p9)
}
  0x32   :  { %46 = dma.hbm_to_vmem [thread:$0]  %s4091_s2, 128, %s44_s15, [#allocation6]  }
  0x33   :  { %3205 = dma.done.wait [#allocation3], 4096  }
  0x34   :  { %3206 = vsyncadd [#allocation3], 4294963200 }
  0x35   :  { %3207 = dma.done.wait [#allocation6], 10368  }
  0x36   :  { %3208 = vsyncadd [#allocation6], 4294956928  ;;  %v133_v0 = vld [vmem:[#allocation5] sm:$0xff]  ;;  %v134_v1 = vld [vmem:[#allocation5 + $0x8] sm:$0xff]  ;;  %s3217_s2 = smov [#allocation8]  }
  0x37   :  { %v135_v2 = vld [vmem:[#allocation5 + $0x10] sm:$0xff]  ;;  %v2646_v3 = vpack.c.bf16 %v134_v1, %v133_v0  ;;  %v136_v4 = vld [vmem:[#allocation5 + $0x18] sm:$0xff]  ;;  %v137_v6 = vld [vmem:[#allocation5 + $0x20] sm:$0xff]  ;;  %s1982_s25 = sshll.u32 %s3217_s2, 4  ;;  %s1983_s25 = int_to_ptr.vmem [resolvable:$true] %s1982_s25 }
  0x38   :  { %v2650_v5 = vpack.c.bf16 %v136_v4, %v135_v2  ;;  %v138_v7 = vld [vmem:[#allocation5 + $0x28] sm:$0xff]  ;;  %v56_v9 = vld [vmem:[#allocation2] sm:$0xff]  ;;  %v139_v11 = vld [vmem:[#allocation5 + $0x30] sm:$0xff]  ;;  %s3183_s26 = scalar_lea.vmem %s1983_s25, 4096  ;;  %p3188_p11 = scmp.lt.s32.totalorder %s1983_s25, %s1983_s25 }
  0x39   :  { %2647 = vmatprep.subr.bf16.mxu0 %v2646_v3  ;;  %2806 = vmatprep.subr.bf16.mxu1 %v2646_v3  ;;  %v2654_v8 = vpack.c.bf16 %v138_v7, %v137_v6  ;;  %v3292_v10 = vld [vmem:[#allocation7 + $0x5] ss:$0 sm:$0xff]  ;;  %v140_v12 = vld [vmem:[#allocation5 + $0x38] sm:$0xff]  ;;  %v142_v16 = vld [vmem:[#allocation5 + $0x48] sm:$0xff]  ;;  %p3184_p10 = scmp.ne.s32.totalorder %s1983_s25, %s3183_s26  ;;  %p3189_p12 = scmp.lt.s32.totalorder %s3183_s26, %s3183_s26 }
  0x3a   :  { %2649 = vmatpush3.bf16.msra.mxu0 %v2646_v3  ;;  %2814 = vmatpush3.bf16.msra.mxu1 %v2646_v3  ;;  %v101_v13 = vmul.f32 %v3292_v10, %v56_v9  ;;  %v2658_v14 = vpack.c.bf16 %v140_v12, %v139_v11  ;;  %v141_v15 = vld [vmem:[#allocation5 + $0x40] sm:$0xff]  ;;  %v143_v20 = vld [vmem:[#allocation5 + $0x50] sm:$0xff]  ;;  %v144_v21 = vld [vmem:[#allocation5 + $0x58] sm:$0xff] }
  0x3b   :  { %2651 = vmatprep.subr.bf16.mxu0 %v2650_v5  ;;  %2807 = vmatprep.subr.bf16.mxu1 %v2650_v5  ;;  %v72_v17 = vld [vmem:[#allocation2 + $0x80] sm:$0xff]  ;;  %v2662_v19 = vpack.c.bf16 %v142_v16, %v141_v15  ;;  %v2666_v22 = vpack.c.bf16 %v144_v21, %v143_v20  ;;  %v146_v24 = vld [vmem:[#allocation5 + $0x68] sm:$0xff]  ;;  %v147_v26 = vld [vmem:[#allocation5 + $0x70] sm:$0xff]  ;;  %p3190_p13 = por %p3189_p12, %p3188_p11 }
  0x3c   :  { %2278 = vmatprep.mubr.f32.mxu0 %v101_v13  ;;  %v117_v18 = vmul.f32 %v3292_v10, %v72_v17  ;;  %v145_v23 = vld [vmem:[#allocation5 + $0x60] sm:$0xff]  ;;  %v148_v27 = vld [vmem:[#allocation5 + $0x78] sm:$0xff]  ;;  %v481_v30 = vld [vmem:[#allocation5 + $0x88] sm:$0xff] }
  0x3d   :  { %v2670_v25 = vpack.c.bf16 %v146_v24, %v145_v23  ;;  %v2674_v28 = vpack.c.bf16 %v148_v27, %v147_v26  ;;  %v480_v29 = vld [vmem:[#allocation5 + $0x80] sm:$0xff]  ;;  %v57_v31 = vld [vmem:[#allocation2 + $0x8] sm:$0xff]  ;;  %v58_v33 = vld [vmem:[#allocation2 + $0x10] sm:$0xff]  ;;  %p3191_p0 = pnand %p3190_p13, %p3184_p10 }
  0x3e   :  { %2653 = vmatpush3.bf16.msra.mxu0 %v2650_v5  ;;  %2815 = vmatpush3.bf16.msra.mxu1 %v2650_v5  ;;  %v73_v32 = vld [vmem:[#allocation2 + $0x88] sm:$0xff]  ;;  %v74_v34 = vld [vmem:[#allocation2 + $0x90] sm:$0xff]  ;;  %v2678_v35 = vpack.c.bf16 %v481_v30, %v480_v29  ;;  %v102_v36 = vmul.f32 %v3292_v10, %v57_v31  ;;  %v483_v39 = vld [vmem:[#allocation5 + $0x98] sm:$0xff]  ;;  %v103_v40 = vmul.f32 %v3292_v10, %v58_v33 }
  0x3f   :  { %2655 = vmatprep.subr.bf16.mxu0 %v2654_v8  ;;  %2808 = vmatprep.subr.bf16.mxu1 %v2654_v8  ;;  %v118_v37 = vmul.f32 %v3292_v10, %v73_v32  ;;  %v482_v38 = vld [vmem:[#allocation5 + $0x90] sm:$0xff]  ;;  %v59_v41 = vld [vmem:[#allocation2 + $0x18] sm:$0xff]  ;;  %v119_v42 = vmul.f32 %v3292_v10, %v74_v34  ;;  %v60_v44 = vld [vmem:[#allocation2 + $0x20] sm:$0xff] }
  0x40   :  { %2302 = vmatprep.mubr.f32.mxu1 %v117_v18  ;;  %v75_v43 = vld [vmem:[#allocation2 + $0x98] sm:$0xff]  ;;  %v76_v45 = vld [vmem:[#allocation2 + $0xa0] sm:$0xff]  ;;  %v2682_v46 = vpack.c.bf16 %v483_v39, %v482_v38  ;;  %v104_v47 = vmul.f32 %v3292_v10, %v59_v41  ;;  %v485_v50 = vld [vmem:[#allocation5 + $0xa8] sm:$0xff]  ;;  %v105_v51 = vmul.f32 %v3292_v10, %v60_v44 }
  0x41   :  { %v120_v48 = vmul.f32 %v3292_v10, %v75_v43  ;;  %v484_v49 = vld [vmem:[#allocation5 + $0xa0] sm:$0xff]  ;;  %v61_v52 = vld [vmem:[#allocation2 + $0x28] sm:$0xff]  ;;  %v121_v53 = vmul.f32 %v3292_v10, %v76_v45  ;;  %v62_v55 = vld [vmem:[#allocation2 + $0x30] sm:$0xff] }
  0x42   :  { %2657 = vmatpush3.bf16.msra.mxu0 %v2654_v8  ;;  %2816 = vmatpush3.bf16.msra.mxu1 %v2654_v8  ;;  %v77_v54 = vld [vmem:[#allocation2 + $0xa8] sm:$0xff]  ;;  %v78_v56 = vld [vmem:[#allocation2 + $0xb0] sm:$0xff]  ;;  %v2686_v57 = vpack.c.bf16 %v485_v50, %v484_v49  ;;  %v106_v58 = vmul.f32 %v3292_v10, %v61_v52  ;;  %v487_v61 = vld [vmem:[#allocation5 + $0xb8] sm:$0xff]  ;;  %v107_v62 = vmul.f32 %v3292_v10, %v62_v55 }
  0x43   :  { %2659 = vmatprep.subr.bf16.mxu0 %v2658_v14  ;;  %2809 = vmatprep.subr.bf16.mxu1 %v2658_v14  ;;  %v122_v59 = vmul.f32 %v3292_v10, %v77_v54  ;;  %v486_v60 = vld [vmem:[#allocation5 + $0xb0] sm:$0xff]  ;;  %v63_v63 = vld [vmem:[#allocation2 + $0x38] sm:$0xff]  ;;  %v123_v0 = vmul.f32 %v3292_v10, %v78_v56  ;;  %v64_v2 = vld [vmem:[#allocation2 + $0x40] sm:$0xff] }
  0x44   :  { %v79_v1 = vld [vmem:[#allocation2 + $0xb8] sm:$0xff]  ;;  %v80_v3 = vld [vmem:[#allocation2 + $0xc0] sm:$0xff]  ;;  %v2690_v4 = vpack.c.bf16 %v487_v61, %v486_v60  ;;  %v108_v5 = vmul.f32 %v3292_v10, %v63_v63  ;;  %v109_v7 = vmul.f32 %v3292_v10, %v64_v2  ;;  %v65_v8 = vld [vmem:[#allocation2 + $0x48] sm:$0xff]  ;;  %v443_v61 = vlaneseq }
  0x45   :  { %v124_v6 = vmul.f32 %v3292_v10, %v79_v1  ;;  %v125_v9 = vmul.f32 %v3292_v10, %v80_v3  ;;  %v81_v11 = vld [vmem:[#allocation2 + $0xc8] sm:$0xff]  ;;  %v66_v12 = vld [vmem:[#allocation2 + $0x50] sm:$0xff]  ;;  %v67_v17 = vld [vmem:[#allocation2 + $0x58] sm:$0xff] }
  0x46   :  { %2661 = vmatpush3.bf16.msra.mxu0 %v2658_v14  ;;  %2817 = vmatpush3.bf16.msra.mxu1 %v2658_v14  ;;  %v82_v13 = vld [vmem:[#allocation2 + $0xd0] sm:$0xff]  ;;  %v110_v14 = vmul.f32 %v3292_v10, %v65_v8  ;;  %v126_v15 = vmul.f32 %v3292_v10, %v81_v11  ;;  %v111_v16 = vmul.f32 %v3292_v10, %v66_v12  ;;  %v68_v20 = vld [vmem:[#allocation2 + $0x60] sm:$0xff]  ;;  %v85_v27 = vld [vmem:[#allocation2 + $0xe8] sm:$0xff]  ;;  %v444_v1 = vshrl.u32 %v443_v61, 7 }
  0x47   :  { %2663 = vmatprep.subr.bf16.mxu0 %v2662_v19  ;;  %2810 = vmatprep.subr.bf16.mxu1 %v2662_v19  ;;  %v127_v18 = vmul.f32 %v3292_v10, %v82_v13  ;;  %v84_v21 = vld [vmem:[#allocation2 + $0xe0] sm:$0xff]  ;;  %v113_v24 = vmul.f32 %v3292_v10, %v68_v20  ;;  %v86_v29 = vld [vmem:[#allocation2 + $0xf0] sm:$0xff]  ;;  %v130_v31 = vmul.f32 %v3292_v10, %v85_v27  ;;  %v71_v33 = vld [vmem:[#allocation2 + $0x78] sm:$0xff]  ;;  %v3216_v13 = vmov 0  }
  0x48   :  { %v129_v26 = vmul.f32 %v3292_v10, %v84_v21  ;;  %v131_v34 = vmul.f32 %v3292_v10, %v86_v29  ;;  %v488_v38 = vld [vmem:[#allocation5 + $0xc0] sm:$0xff]  ;;  %v489_v39 = vld [vmem:[#allocation5 + $0xc8] sm:$0xff]  ;;  %v490_v41 = vld [vmem:[#allocation5 + $0xd0] sm:$0xff]  ;;  %v445_v8 = vsub.s32 0, %v444_v1 }
  0x49   :  { %v492_v44 = vld [vmem:[#allocation5 + $0xe0] sm:$0xff]  ;;  %v493_v45 = vld [vmem:[#allocation5 + $0xe8] sm:$0xff] }
  0x4a   :  { %2665 = vmatpush3.bf16.msra.mxu0 %v2662_v19  ;;  %2818 = vmatpush3.bf16.msra.mxu1 %v2662_v19  ;;  %v83_v19 = vld [vmem:[#allocation2 + $0xd8] sm:$0xff]  ;;  %v821_v49 = vld [vmem:[#allocation5 + $0x100] sm:$0xff]  ;;  %v822_v50 = vld [vmem:[#allocation5 + $0x108] sm:$0xff] }
  0x4b   :  { %2667 = vmatprep.subr.bf16.mxu0 %v2666_v22  ;;  %2811 = vmatprep.subr.bf16.mxu1 %v2666_v22  ;;  %v128_v23 = vmul.f32 %v3292_v10, %v83_v19  ;;  %v2710_v52 = vpack.c.bf16 %v822_v50, %v821_v49  ;;  %v825_v55 = vld [vmem:[#allocation5 + $0x120] sm:$0xff]  ;;  %v826_v56 = vld [vmem:[#allocation5 + $0x128] sm:$0xff] }
  0x4c   :  { %v95_v63 = vld [vmem:[#allocation7 + $0x7] sm:$0x1] }
  0x4d   :  { %vm96_vm0 = vcmp.gt.f32.partialorder %v95_v63, 0.5 }
  0x4e   :  { %2669 = vmatpush3.bf16.msra.mxu0 %v2666_v22  ;;  %2819 = vmatpush3.bf16.msra.mxu1 %v2666_v22  ;;  %v112_v22 = vmul.f32 %v3292_v10, %v67_v17 }
  0x4f   :  { %2671 = vmatprep.subr.bf16.mxu0 %v2670_v25  ;;  %2812 = vmatprep.subr.bf16.mxu1 %v2670_v25 }
  0x52   :  { %2673 = vmatpush3.bf16.msra.mxu0 %v2670_v25  ;;  %2820 = vmatpush3.bf16.msra.mxu1 %v2670_v25  ;;  %v69_v25 = vld [vmem:[#allocation2 + $0x68] sm:$0xff] }
  0x53   :  { %2675 = vmatprep.subr.bf16.mxu0 %v2674_v28  ;;  %2813 = vmatprep.subr.bf16.mxu1 %v2674_v28  ;;  %v114_v30 = vmul.f32 %v3292_v10, %v69_v25 }
  0x56   :  { %2677 = vmatpush3.bf16.msra.mxu0 %v2674_v28  ;;  %2821 = vmatpush3.bf16.msra.mxu1 %v2674_v28  ;;  %v70_v28 = vld [vmem:[#allocation2 + $0x70] sm:$0xff] }
  0x57   :  { %2679 = vmatprep.subr.bf16.mxu1 %v2678_v35  ;;  %v115_v32 = vmul.f32 %v3292_v10, %v70_v28  ;;  %2711 = vmatprep.subr.bf16.mxu0 %v2710_v52 }
  0x59   :  { %2279 = vmatmul.mubr.f32.vlgmr.msra.gmra.mrb[0].mxu0 %v102_v36  ;;  %2303 = vmatmul.mubr.f32.vlgmr.msra.gmra.mrb[0].mxu1 %v118_v37  ;;  %v116_v36 = vmul.f32 %v3292_v10, %v71_v33 }
  0x5a   :  { %2281 = vmatprep.mubr.f32.mxu0 %v103_v40  ;;  %2305 = vmatprep.mubr.f32.mxu1 %v119_v42  ;;  %v2694_v40 = vpack.c.bf16 %v489_v39, %v488_v38  ;;  %v491_v42 = vld [vmem:[#allocation5 + $0xd8] sm:$0xff] }
  0x5b   :  { %2681 = vmatpush3.bf16.msra.mxu1 %v2678_v35  ;;  %v87_v35 = vld [vmem:[#allocation2 + $0xf8] sm:$0xff]  ;;  %v2698_v43 = vpack.c.bf16 %v491_v42, %v490_v41  ;;  %2713 = vmatpush3.bf16.msra.mxu0 %v2710_v52 }
  0x5c   :  { %2683 = vmatprep.subr.bf16.mxu1 %v2682_v46  ;;  %v132_v37 = vmul.f32 %v3292_v10, %v87_v35  ;;  %v494_v10 = vld [vmem:[#allocation5 + $0xf0] sm:$0xff] }
  0x5d   :  { %2282 = vmatmul.mubr.f32.gmra.mrb[2].mxu0 %v104_v47  ;;  %2306 = vmatmul.mubr.f32.gmra.mrb[2].mxu1 %v120_v48  ;;  %v495_v47 = vld [vmem:[#allocation5 + $0xf8] sm:$0xff] }
  0x5e   :  { %2284 = vmatprep.mubr.f32.mxu0 %v105_v51  ;;  %2308 = vmatprep.mubr.f32.mxu1 %v121_v53  ;;  %v2706_v48 = vpack.c.bf16 %v495_v47, %v494_v10  ;;  %v823_v51 = vld [vmem:[#allocation5 + $0x110] sm:$0xff]  ;;  %v824_v53 = vld [vmem:[#allocation5 + $0x118] sm:$0xff] }
  0x5f   :  { %2685 = vmatpush3.bf16.msra.mxu1 %v2682_v46  ;;  %v2702_v46 = vpack.c.bf16 %v493_v45, %v492_v44  ;;  %v2714_v54 = vpack.c.bf16 %v824_v53, %v823_v51 }
  0x60   :  { %2687 = vmatprep.subr.bf16.mxu1 %v2686_v57 }
  0x61   :  { %2285 = vmatmul.mubr.f32.gmra.mrb[4].mxu0 %v106_v58  ;;  %2309 = vmatmul.mubr.f32.gmra.mrb[4].mxu1 %v122_v59  ;;  %v827_v58 = vld [vmem:[#allocation5 + $0x130] sm:$0xff]  ;;  %v828_v59 = vld [vmem:[#allocation5 + $0x138] sm:$0xff] }
  0x62   :  { %2287 = vmatprep.mubr.f32.mxu0 %v107_v62  ;;  %2311 = vmatprep.mubr.f32.mxu1 %v123_v0  ;;  %v2722_v60 = vpack.c.bf16 %v828_v59, %v827_v58  ;;  %v3326_v62 = vld [vmem:[#allocation7] ss:$0 sm:$0xff] }
  0x63   :  { %2689 = vmatpush3.bf16.msra.mxu1 %v2686_v57  ;;  %2715 = vmatprep.subr.bf16.mxu0 %v2714_v54  ;;  %v2718_v57 = vpack.c.bf16 %v826_v56, %v825_v55 }
  0x64   :  { %2691 = vmatprep.subr.bf16.mxu1 %v2690_v4  ;;  %2717 = vmatpush3.bf16.msra.mxu0 %v2714_v54 }
  0x65   :  { %2288 = vmatmul.mubr.f32.gmra.mrb[6].mxu0 %v108_v5  ;;  %2312 = vmatmul.mubr.f32.gmra.mrb[6].mxu1 %v124_v6 }
  0x66   :  { %2290 = vmatprep.mubr.f32.mxu0 %v109_v7  ;;  %2314 = vmatprep.mubr.f32.mxu1 %v125_v9 }
  0x67   :  { %2693 = vmatpush3.bf16.msra.mxu1 %v2690_v4  ;;  %2719 = vmatprep.subr.bf16.mxu0 %v2718_v57 }
  0x68   :  { %2695 = vmatprep.subr.bf16.mxu1 %v2694_v40  ;;  %2721 = vmatpush3.bf16.msra.mxu0 %v2718_v57 }
  0x69   :  { %2291 = vmatmul.mubr.f32.gmra.mrb[8].mxu0 %v110_v14  ;;  %2315 = vmatmul.mubr.f32.gmra.mrb[8].mxu1 %v126_v15  ;;  %v442_v14 = vsel %vm96_vm0, 1, %v3216_v13 }
  0x6a   :  { %2293 = vmatprep.mubr.f32.mxu0 %v111_v16  ;;  %2317 = vmatprep.mubr.f32.mxu1 %v127_v18  ;;  %v3340_v18 = vrot.slane %v442_v14, %v445_v8 }
  0x6b   :  { %2697 = vmatpush3.bf16.msra.mxu1 %v2694_v40  ;;  %2723 = vmatprep.subr.bf16.mxu0 %v2722_v60 }
  0x6c   :  { %2699 = vmatprep.subr.bf16.mxu1 %v2698_v43  ;;  %2725 = vmatpush3.bf16.msra.mxu0 %v2722_v60  ;;  %vm447_vm1 = vcmp.eq.s32.totalorder %v3340_v18, 1 }
  0x6d   :  { %2294 = vmatmul.mubr.f32.gmra.mrb[10].mxu0 %v112_v22  ;;  %2318 = vmatmul.mubr.f32.gmra.mrb[10].mxu1 %v128_v23 }
  0x6e   :  { %2296 = vmatprep.mubr.f32.mxu0 %v113_v24  ;;  %2320 = vmatprep.mubr.f32.mxu1 %v129_v26 }
  0x6f   :  { %2701 = vmatpush3.bf16.msra.mxu1 %v2698_v43 }
  0x70   :  { %2703 = vmatprep.subr.bf16.mxu1 %v2702_v46 }
  0x71   :  { %2297 = vmatmul.mubr.f32.gmra.mrb[12].mxu0 %v114_v30  ;;  %2321 = vmatmul.mubr.f32.gmra.mrb[12].mxu1 %v130_v31 }
  0x72   :  { %2299 = vmatprep.mubr.f32.mxu0 %v115_v32  ;;  %2323 = vmatprep.mubr.f32.mxu1 %v131_v34 }
  0x73   :  { %2705 = vmatpush3.bf16.msra.mxu1 %v2702_v46 }
  0x74   :  { %2707 = vmatprep.subr.bf16.mxu1 %v2706_v48 }
  0x75   :  { %2300 = vmatmul.mubr.f32.gmra.mrb[14].mxu0 %v116_v36  ;;  %2324 = vmatmul.mubr.f32.gmra.mrb[14].mxu1 %v132_v37 }
  0x77   :  { %2709 = vmatpush3.bf16.msra.mxu1 %v2706_v48 }
 0x12c   :  { %v2280_v0 = vpop.f32.mrb[0].mxu0  ;;  %v3328_v2 = vpop.f32.mrb[0].mxu1 }
 0x12d   :  { %v225_v3 = vadd.f32 %v2280_v0, %v3326_v62  ;;  %v219_v4 = vpop.f32.mrb[1].mxu0  ;;  %v3331_v5 = vpop.f32.mrb[1].mxu1 }
 0x12e   :  { %v220_v6 = vadd.f32 %v3326_v62, %v219_v4  ;;  %v3390_v8 = vadd.f32 %v3326_v62, %v3331_v5 }
 0x12f   :  { %2829 = vtanh.f32 %v225_v3  ;;  %v379_v32 = vmax.f32 %v225_v3, 0.0 }
 0x130   :  { %2831 = vtanh.f32 %v220_v6  ;;  %v2283_v7 = vpop.f32.mrb[2].mxu0  ;;  %v3334_v9 = vpop.f32.mrb[2].mxu1  ;;  %v378_v27 = vmax.f32 %v220_v6, 0.0 }
 0x131   :  { %v235_v11 = vadd.f32 %v2283_v7, %v3326_v62  ;;  %v229_v12 = vpop.f32.mrb[3].mxu0  ;;  %v3337_v15 = vpop.f32.mrb[3].mxu1 }
 0x132   :  { %v230_v16 = vadd.f32 %v3326_v62, %v229_v12 }
 0x133   :  { %2833 = vtanh.f32 %v235_v11  ;;  %v381_v44 = vmax.f32 %v235_v11, 0.0 }
 0x134   :  { %2835 = vtanh.f32 %v230_v16  ;;  %v2286_v17 = vpop.f32.mrb[4].mxu0  ;;  %v3342_v19 = vpop.f32.mrb[4].mxu1  ;;  %v380_v39 = vmax.f32 %v230_v16, 0.0 }
 0x135   :  { %v245_v20 = vadd.f32 %v2286_v17, %v3326_v62  ;;  %v239_v21 = vpop.f32.mrb[5].mxu0  ;;  %v3345_v22 = vpop.f32.mrb[5].mxu1 }
 0x136   :  { %v240_v23 = vadd.f32 %v3326_v62, %v239_v21 }
 0x137   :  { %2837 = vtanh.f32 %v245_v20  ;;  %v383_v55 = vmax.f32 %v245_v20, 0.0 }
 0x138   :  { %2839 = vtanh.f32 %v240_v23  ;;  %v2289_v24 = vpop.f32.mrb[6].mxu0  ;;  %v3349_v25 = vpop.f32.mrb[6].mxu1  ;;  %v382_v50 = vmax.f32 %v240_v23, 0.0 }
 0x139   :  { %v2830_v26 = vpop.eup %2829  ;;  %v255_v28 = vadd.f32 %v2289_v24, %v3326_v62  ;;  %v249_v29 = vpop.f32.mrb[7].mxu0 }
 0x13a   :  { %v3352_v30 = vpop.f32.mrb[7].mxu1  ;;  %v2832_v31 = vpop.eup %2831  ;;  %v250_v33 = vadd.f32 %v3326_v62, %v249_v29  ;;  %v449_v36 = vsel %vm447_vm1, %v379_v32, %v2830_v26  ;;  %v310_v29 = vadd.f32 %v3326_v62, %v3337_v15  ;;  %v320_v15 = vadd.f32 %v3326_v62, %v3345_v22 }
 0x13b   :  { %2841 = vtanh.f32 %v255_v28  ;;  %v448_v34 = vsel %vm447_vm1, %v378_v27, %v2832_v31  ;;  %v385_v6 = vmax.f32 %v255_v28, 0.0  ;;  %v305_v27 = vadd.f32 %v3328_v2, %v3326_v62 }
 0x13c   :  { %2843 = vtanh.f32 %v250_v33  ;;  %v2292_v35 = vpop.f32.mrb[8].mxu0  ;;  %2358 = vmatprep.mubr.f32.mxu1 %v448_v34  ;;  %v3359_v37 = vpop.f32.mrb[8].mxu1  ;;  %v384_v63 = vmax.f32 %v250_v33, 0.0  ;;  %v315_v2 = vadd.f32 %v3334_v9, %v3326_v62  ;;  %v325_v9 = vadd.f32 %v3342_v19, %v3326_v62 }
 0x13d   :  { %v2834_v38 = vpop.eup %2833  ;;  %v3362_v40 = vadd.f32 %v2292_v35, %v3326_v62  ;;  %v259_v41 = vpop.f32.mrb[9].mxu0  ;;  %2359 = vmatmul.mubr.f32.vlgmr.msra.gmra.mrb[16].mxu1 %v449_v36  ;;  %v330_v22 = vadd.f32 %v3326_v62, %v3352_v30  ;;  %v335_v19 = vadd.f32 %v3349_v25, %v3326_v62  ;;  %v345_v25 = vadd.f32 %v3359_v37, %v3326_v62 }
 0x13e   :  { %v3364_v42 = vpop.f32.mrb[9].mxu1  ;;  %v2836_v43 = vpop.eup %2835  ;;  %v260_v45 = vadd.f32 %v3326_v62, %v259_v41  ;;  %v451_v47 = vsel %vm447_vm1, %v381_v44, %v2834_v38 }
 0x13f   :  { %2845 = vtanh.f32 %v3362_v40  ;;  %v450_v46 = vsel %vm447_vm1, %v380_v39, %v2836_v43  ;;  %v387_v24 = vmax.f32 %v3362_v40, 0.0  ;;  %v340_v30 = vadd.f32 %v3326_v62, %v3364_v42 }
 0x140   :  { %2847 = vtanh.f32 %v260_v45  ;;  %v2295_v10 = vpop.f32.mrb[10].mxu0  ;;  %2361 = vmatprep.mubr.f32.mxu1 %v450_v46  ;;  %v3372_v48 = vpop.f32.mrb[10].mxu1  ;;  %v386_v17 = vmax.f32 %v260_v45, 0.0 }
 0x141   :  { %v2838_v49 = vpop.eup %2837  ;;  %v275_v51 = vadd.f32 %v2295_v10, %v3326_v62  ;;  %v269_v52 = vpop.f32.mrb[11].mxu0  ;;  %2362 = vmatmul.mubr.f32.gmra.mrb[18].mxu1 %v451_v47  ;;  %v394_v47 = vmax.f32 %v3390_v8, 0.0  ;;  %v355_v37 = vadd.f32 %v3372_v48, %v3326_v62 }
 0x142   :  { %v3375_v53 = vpop.f32.mrb[11].mxu1  ;;  %v2840_v54 = vpop.eup %2839  ;;  %v270_v56 = vadd.f32 %v3326_v62, %v269_v52  ;;  %v453_v59 = vsel %vm447_vm1, %v383_v55, %v2838_v49 }
 0x143   :  { %2849 = vtanh.f32 %v275_v51  ;;  %v452_v57 = vsel %vm447_vm1, %v382_v50, %v2840_v54  ;;  %v389_v35 = vmax.f32 %v275_v51, 0.0  ;;  %v395_v54 = vmax.f32 %v305_v27, 0.0 }
 0x144   :  { %2851 = vtanh.f32 %v270_v56  ;;  %v2298_v58 = vpop.f32.mrb[12].mxu0  ;;  %2364 = vmatprep.mubr.f32.mxu1 %v452_v57  ;;  %v3382_v60 = vpop.f32.mrb[12].mxu1  ;;  %v388_v33 = vmax.f32 %v270_v56, 0.0  ;;  %v396_v57 = vmax.f32 %v310_v29, 0.0  ;;  %v350_v42 = vadd.f32 %v3326_v62, %v3375_v53 }
 0x145   :  { %v2842_v61 = vpop.eup %2841  ;;  %v285_v0 = vadd.f32 %v2298_v58, %v3326_v62  ;;  %v279_v1 = vpop.f32.mrb[13].mxu0  ;;  %2365 = vmatmul.mubr.f32.gmra.mrb[20].mxu1 %v453_v59  ;;  %v365_v48 = vadd.f32 %v3382_v60, %v3326_v62 }
 0x146   :  { %v3385_v3 = vpop.f32.mrb[13].mxu1  ;;  %v2844_v4 = vpop.eup %2843  ;;  %v280_v7 = vadd.f32 %v3326_v62, %v279_v1  ;;  %v455_v13 = vsel %vm447_vm1, %v385_v6, %v2842_v61  ;;  %v397_v61 = vmax.f32 %v315_v2, 0.0  ;;  %v398_v1 = vmax.f32 %v320_v15, 0.0 }
 0x147   :  { %2853 = vtanh.f32 %v285_v0  ;;  %v454_v11 = vsel %vm447_vm1, %v384_v63, %v2844_v4  ;;  %v391_v43 = vmax.f32 %v285_v0, 0.0  ;;  %v360_v53 = vadd.f32 %v3326_v62, %v3385_v3 }
 0x148   :  { %2855 = vtanh.f32 %v280_v7  ;;  %v2301_v12 = vpop.f32.mrb[14].mxu0  ;;  %2367 = vmatprep.mubr.f32.mxu1 %v454_v11  ;;  %v3396_v14 = vpop.f32.mrb[14].mxu1  ;;  %v390_v40 = vmax.f32 %v280_v7, 0.0  ;;  %v399_v7 = vmax.f32 %v325_v9, 0.0 }
 0x149   :  { %v2846_v16 = vpop.eup %2845  ;;  %v295_v20 = vadd.f32 %v2301_v12, %v3326_v62  ;;  %v289_v21 = vpop.f32.mrb[15].mxu0  ;;  %2368 = vmatmul.mubr.f32.gmra.mrb[22].mxu1 %v455_v13  ;;  %2857 = vtanh.f32 %v3390_v8  ;;  %v400_v12 = vmax.f32 %v330_v22, 0.0  ;;  %v375_v60 = vadd.f32 %v3396_v14, %v3326_v62 }
 0x14a   :  { %v3399_v5 = vpop.f32.mrb[15].mxu1  ;;  %v2848_v23 = vpop.eup %2847  ;;  %v290_v26 = vadd.f32 %v3326_v62, %v289_v21  ;;  %v457_v31 = vsel %vm447_vm1, %v387_v24, %v2846_v16 }
 0x14b   :  { %2859 = vtanh.f32 %v295_v20  ;;  %v456_v28 = vsel %vm447_vm1, %v386_v17, %v2848_v23  ;;  %v393_v51 = vmax.f32 %v295_v20, 0.0  ;;  %v401_v17 = vmax.f32 %v335_v19, 0.0 }
 0x14c   :  { %2861 = vtanh.f32 %v290_v26  ;;  %2370 = vmatprep.mubr.f32.mxu1 %v456_v28  ;;  %v392_v49 = vmax.f32 %v290_v26, 0.0  ;;  %v370_v3 = vadd.f32 %v3326_v62, %v3399_v5  ;;  %v402_v23 = vmax.f32 %v340_v30, 0.0 }
 0x14d   :  { %v2850_v32 = vpop.eup %2849  ;;  %2371 = vmatmul.mubr.f32.gmra.mrb[24].mxu1 %v457_v31  ;;  %2863 = vtanh.f32 %v305_v27  ;;  %v403_v27 = vmax.f32 %v345_v25, 0.0  ;;  %v406_v62 = vmax.f32 %v360_v53, 0.0 }
 0x14e   :  { %v2852_v34 = vpop.eup %2851  ;;  %2865 = vtanh.f32 %v310_v29  ;;  %v459_v38 = vsel %vm447_vm1, %v389_v35, %v2850_v32  ;;  %v404_v29 = vmax.f32 %v350_v42, 0.0 }
 0x14f   :  { %v458_v36 = vsel %vm447_vm1, %v388_v33, %v2852_v34  ;;  %2867 = vtanh.f32 %v315_v2  ;;  %v405_v33 = vmax.f32 %v355_v37, 0.0 }
 0x150   :  { %2373 = vmatprep.mubr.f32.mxu1 %v458_v36  ;;  %2869 = vtanh.f32 %v320_v15  ;;  %v407_v36 = vmax.f32 %v365_v48, 0.0 }
 0x151   :  { %v2854_v39 = vpop.eup %2853  ;;  %2374 = vmatmul.mubr.f32.gmra.mrb[26].mxu1 %v459_v38  ;;  %2871 = vtanh.f32 %v325_v9 }
 0x152   :  { %v2856_v41 = vpop.eup %2855  ;;  %v461_v46 = vsel %vm447_vm1, %v391_v43, %v2854_v39  ;;  %2873 = vtanh.f32 %v330_v22  ;;  %v408_v39 = vmax.f32 %v370_v3, 0.0  ;;  %v409_v43 = vmax.f32 %v375_v60, 0.0 }
 0x153   :  { %v460_v44 = vsel %vm447_vm1, %v390_v40, %v2856_v41  ;;  %v2858_v45 = vpop.eup %2857  ;;  %2875 = vtanh.f32 %v335_v19  ;;  %v833_v19 = vld [vmem:[#allocation5 + $0x160] sm:$0xff] }
 0x154   :  { %2376 = vmatprep.mubr.f32.mxu1 %v460_v44  ;;  %v464_v58 = vsel %vm447_vm1, %v394_v47, %v2858_v45  ;;  %2877 = vtanh.f32 %v340_v30  ;;  %v835_v30 = vld [vmem:[#allocation5 + $0x170] sm:$0xff] }
 0x155   :  { %v2860_v10 = vpop.eup %2859  ;;  %2377 = vmatmul.mubr.f32.gmra.mrb[28].mxu1 %v461_v46  ;;  %2879 = vtanh.f32 %v345_v25  ;;  %v829_v46 = vld [vmem:[#allocation5 + $0x140] sm:$0xff] }
 0x156   :  { %v2862_v50 = vpop.eup %2861  ;;  %v463_v55 = vsel %vm447_vm1, %v393_v51, %v2860_v10  ;;  %2881 = vtanh.f32 %v350_v42  ;;  %v830_v10 = vld [vmem:[#allocation5 + $0x148] sm:$0xff]  ;;  %v1162_v25 = vld [vmem:[#allocation5 + $0x180] sm:$0xff] }
 0x157   :  { %v462_v52 = vsel %vm447_vm1, %v392_v49, %v2862_v50  ;;  %v2864_v56 = vpop.eup %2863  ;;  %2883 = vtanh.f32 %v355_v37  ;;  %v2726_v47 = vpack.c.bf16 %v830_v10, %v829_v46  ;;  %v831_v49 = vld [vmem:[#allocation5 + $0x150] sm:$0xff]  ;;  %v832_v50 = vld [vmem:[#allocation5 + $0x158] sm:$0xff] }
 0x158   :  { %2379 = vmatprep.mubr.f32.mxu1 %v462_v52  ;;  %v2866_v59 = vpop.eup %2865  ;;  %v465_v63 = vsel %vm447_vm1, %v395_v54, %v2864_v56  ;;  %2885 = vtanh.f32 %v360_v53  ;;  %v2730_v51 = vpack.c.bf16 %v832_v50, %v831_v49  ;;  %v834_v52 = vld [vmem:[#allocation5 + $0x168] sm:$0xff]  ;;  %v1169_v53 = vld [vmem:[#allocation5 + $0x1b8] sm:$0xff]  ;;  %v1413_v50 = vld [vmem:[#allocation5 + $0x230] sm:$0xff] }
 0x159   :  { %2380 = vmatmul.mubr.f32.gmra.mrb[30].mxu1 %v463_v55  ;;  %v2868_v0 = vpop.eup %2867  ;;  %v466_v4 = vsel %vm447_vm1, %v396_v57, %v2866_v59  ;;  %2887 = vtanh.f32 %v365_v48  ;;  %2727 = vmatprep.subr.bf16.mxu0 %v2726_v47  ;;  %v2734_v54 = vpack.c.bf16 %v834_v52, %v833_v19  ;;  %v836_v55 = vld [vmem:[#allocation5 + $0x178] sm:$0xff]  ;;  %v1407_v57 = vld [vmem:[#allocation5 + $0x200] sm:$0xff] }
 0x15a   :  { %2382 = vmatprep.mubr.f32.mxu1 %v464_v58  ;;  %v2870_v6 = vpop.eup %2869  ;;  %v467_v8 = vsel %vm447_vm1, %v397_v61, %v2868_v0  ;;  %2889 = vtanh.f32 %v370_v3  ;;  %2729 = vmatpush3.bf16.msra.mxu0 %v2726_v47  ;;  %v2738_v56 = vpack.c.bf16 %v836_v55, %v835_v30  ;;  %v1408_v58 = vld [vmem:[#allocation5 + $0x208] sm:$0xff]  ;;  %v1165_v0 = vld [vmem:[#allocation5 + $0x198] sm:$0xff] }
 0x15b   :  { %v2872_v11 = vpop.eup %2871  ;;  %v468_v13 = vsel %vm447_vm1, %v398_v1, %v2870_v6  ;;  %2891 = vtanh.f32 %v375_v60  ;;  %2731 = vmatprep.subr.bf16.mxu0 %v2730_v51  ;;  %v3483_v59 = vpack.c.bf16 %v1408_v58, %v1407_v57  ;;  %v1163_v61 = vld [vmem:[#allocation5 + $0x188] sm:$0xff] }
 0x15c   :  { %v2874_v16 = vpop.eup %2873  ;;  %v469_v20 = vsel %vm447_vm1, %v399_v7, %v2872_v11  ;;  %v2742_v42 = vpack.c.bf16 %v1163_v61, %v1162_v25  ;;  %v1167_v6 = vld [vmem:[#allocation5 + $0x1a8] sm:$0xff]  ;;  %v1168_v7 = vld [vmem:[#allocation5 + $0x1b0] sm:$0xff]  ;;  %v3486_v11 = vld [vmem:[#allocation7 + $0x1] ss:$0 sm:$0xff] }
 0x15d   :  { %2383 = vmatmul.mubr.f32.gmra.mrb[32].mxu1 %v465_v63  ;;  %v2876_v21 = vpop.eup %2875  ;;  %v470_v24 = vsel %vm447_vm1, %v400_v12, %v2874_v16  ;;  %v1164_v63 = vld [vmem:[#allocation5 + $0x190] sm:$0xff] }
 0x15e   :  { %2385 = vmatprep.mubr.f32.mxu1 %v466_v4  ;;  %v2878_v26 = vpop.eup %2877  ;;  %v471_v5 = vsel %vm447_vm1, %v401_v17, %v2876_v21  ;;  %2733 = vmatpush3.bf16.msra.mxu0 %v2730_v51  ;;  %v2746_v1 = vpack.c.bf16 %v1165_v0, %v1164_v63  ;;  %v1166_v4 = vld [vmem:[#allocation5 + $0x1a0] sm:$0xff]  ;;  %v1414_v51 = vld [vmem:[#allocation5 + $0x238] sm:$0xff]  ;;  %v1416_v63 = vld [vmem:[#allocation5 + $0x248] sm:$0xff] }
 0x15f   :  { %v2880_v28 = vpop.eup %2879  ;;  %v472_v31 = vsel %vm447_vm1, %v402_v23, %v2878_v26  ;;  %2735 = vmatprep.subr.bf16.mxu0 %v2734_v54  ;;  %2743 = vmatprep.subr.bf16.mxu1 %v2742_v42  ;;  %v2750_v37 = vpack.c.bf16 %v1167_v6, %v1166_v4 }
 0x160   :  { %v2882_v32 = vpop.eup %2881  ;;  %v473_v34 = vsel %vm447_vm1, %v403_v27, %v2880_v28  ;;  %2745 = vmatpush3.bf16.msra.mxu1 %v2742_v42  ;;  %v1410_v28 = vld [vmem:[#allocation5 + $0x218] sm:$0xff]  ;;  %v1415_v42 = vld [vmem:[#allocation5 + $0x240] sm:$0xff] }
 0x161   :  { %2386 = vmatmul.mubr.f32.gmra.mrb[34].mxu1 %v467_v8  ;;  %v2884_v35 = vpop.eup %2883  ;;  %v474_v14 = vsel %vm447_vm1, %v404_v29, %v2882_v32  ;;  %2747 = vmatprep.subr.bf16.mxu1 %v2746_v1  ;;  %v2754_v8 = vpack.c.bf16 %v1169_v53, %v1168_v7 }
 0x162   :  { %2388 = vmatprep.mubr.f32.mxu1 %v468_v13  ;;  %v2886_v2 = vpop.eup %2885  ;;  %v475_v15 = vsel %vm447_vm1, %v405_v33, %v2884_v35  ;;  %2737 = vmatpush3.bf16.msra.mxu0 %v2734_v54 }
 0x163   :  { %v2888_v38 = vpop.eup %2887  ;;  %v476_v40 = vsel %vm447_vm1, %v406_v62, %v2886_v2  ;;  %2739 = vmatprep.subr.bf16.mxu0 %v2738_v56 }
 0x164   :  { %v2890_v41 = vpop.eup %2889  ;;  %v477_v9 = vsel %vm447_vm1, %v407_v36, %v2888_v38  ;;  %2749 = vmatpush3.bf16.msra.mxu1 %v2746_v1  ;;  %v1411_v38 = vld [vmem:[#allocation5 + $0x220] sm:$0xff] }
 0x165   :  { %2389 = vmatmul.mubr.f32.gmra.mrb[36].mxu1 %v469_v20  ;;  %v2892_v44 = vpop.eup %2891  ;;  %v478_v45 = vsel %vm447_vm1, %v408_v39, %v2890_v41  ;;  %2751 = vmatprep.subr.bf16.mxu1 %v2750_v37  ;;  %v1412_v39 = vld [vmem:[#allocation5 + $0x228] sm:$0xff] }
 0x166   :  { %2391 = vmatprep.mubr.f32.mxu1 %v470_v24  ;;  %v479_v22 = vsel %vm447_vm1, %v409_v43, %v2892_v44  ;;  %2741 = vmatpush3.bf16.msra.mxu0 %v2738_v56  ;;  %v2782_v10 = vpack.c.bf16 %v1412_v39, %v1411_v38 }
 0x167   :  { %2775 = vmatprep.subr.bf16.mxu0 %v3483_v59 }
 0x168   :  { %2753 = vmatpush3.bf16.msra.mxu1 %v2750_v37 }
 0x169   :  { %2392 = vmatmul.mubr.f32.gmra.mrb[38].mxu1 %v471_v5  ;;  %2755 = vmatprep.subr.bf16.mxu1 %v2754_v8  ;;  %v1409_v5 = vld [vmem:[#allocation5 + $0x210] sm:$0xff] }
 0x16a   :  { %2394 = vmatprep.mubr.f32.mxu1 %v472_v31  ;;  %v2778_v2 = vpack.c.bf16 %v1410_v28, %v1409_v5 }
 0x16c   :  { %2757 = vmatpush3.bf16.msra.mxu1 %v2754_v8 }
 0x16d   :  { %2395 = vmatmul.mubr.f32.gmra.mrb[40].mxu1 %v473_v34 }
 0x16e   :  { %2397 = vmatprep.mubr.f32.mxu1 %v474_v14 }
 0x171   :  { %2398 = vmatmul.mubr.f32.gmra.mrb[42].mxu1 %v475_v15 }
 0x172   :  { %2400 = vmatprep.mubr.f32.mxu1 %v476_v40 }
 0x175   :  { %2401 = vmatmul.mubr.f32.gmra.mrb[44].mxu1 %v477_v9 }
 0x176   :  { %2403 = vmatprep.mubr.f32.mxu1 %v478_v45 }
 0x179   :  { %2404 = vmatmul.mubr.f32.gmra.mrb[46].mxu1 %v479_v22 }
 0x210   :  { %v2360_v12 = vpop.f32.mrb[16].mxu1 }
 0x211   :  { %v572_v13 = vadd.f32 %v2360_v12, %v3486_v11  ;;  %v566_v16 = vpop.f32.mrb[17].mxu1  ;;  %v2790_v12 = vpack.c.bf16 %v1416_v63, %v1415_v42 }
 0x212   :  { %v567_v48 = vadd.f32 %v3486_v11, %v566_v16 }
 0x213   :  { %2893 = vtanh.f32 %v572_v13  ;;  %v726_v35 = vmax.f32 %v572_v13, 0.0 }
 0x214   :  { %2895 = vtanh.f32 %v567_v48  ;;  %v2363_v17 = vpop.f32.mrb[18].mxu1  ;;  %v725_v31 = vmax.f32 %v567_v48, 0.0  ;;  %v1417_v48 = vld [vmem:[#allocation5 + $0x250] sm:$0xff] }
 0x215   :  { %v582_v3 = vadd.f32 %v2363_v17, %v3486_v11  ;;  %v576_v20 = vpop.f32.mrb[19].mxu1  ;;  %v1418_v17 = vld [vmem:[#allocation5 + $0x258] sm:$0xff] }
 0x216   :  { %v577_v21 = vadd.f32 %v3486_v11, %v576_v20  ;;  %v2794_v5 = vpack.c.bf16 %v1418_v17, %v1417_v48 }
 0x217   :  { %2897 = vtanh.f32 %v582_v3  ;;  %v728_v45 = vmax.f32 %v582_v3, 0.0 }
 0x218   :  { %2899 = vtanh.f32 %v577_v21  ;;  %v2366_v23 = vpop.f32.mrb[20].mxu1  ;;  %v727_v41 = vmax.f32 %v577_v21, 0.0 }
 0x219   :  { %v592_v24 = vadd.f32 %v2366_v23, %v3486_v11  ;;  %v586_v26 = vpop.f32.mrb[21].mxu1 }
 0x21a   :  { %v587_v60 = vadd.f32 %v3486_v11, %v586_v26 }
 0x21b   :  { %2901 = vtanh.f32 %v592_v24  ;;  %v730_v56 = vmax.f32 %v592_v24, 0.0 }
 0x21c   :  { %2903 = vtanh.f32 %v587_v60  ;;  %v2369_v27 = vpop.f32.mrb[22].mxu1  ;;  %v729_v52 = vmax.f32 %v587_v60, 0.0 }
 0x21d   :  { %v2894_v29 = vpop.eup %2893  ;;  %v3495_v32 = vadd.f32 %v2369_v27, %v3486_v11  ;;  %v596_v33 = vpop.f32.mrb[23].mxu1 }
 0x21e   :  { %v2896_v34 = vpop.eup %2895  ;;  %v597_v62 = vadd.f32 %v3486_v11, %v596_v33  ;;  %v790_v15 = vsel %vm447_vm1, %v726_v35, %v2894_v29 }
 0x21f   :  { %2905 = vtanh.f32 %v3495_v32  ;;  %v789_v14 = vsel %vm447_vm1, %v725_v31, %v2896_v34  ;;  %v732_v7 = vmax.f32 %v3495_v32, 0.0 }
 0x220   :  { %2907 = vtanh.f32 %v597_v62  ;;  %v2372_v36 = vpop.f32.mrb[24].mxu1  ;;  %2438 = vmatprep.mubr.f32.mxu0 %v789_v14  ;;  %v731_v1 = vmax.f32 %v597_v62, 0.0 }
 0x221   :  { %v2898_v40 = vpop.eup %2897  ;;  %v3504_v43 = vadd.f32 %v2372_v36, %v3486_v11  ;;  %v606_v9 = vpop.f32.mrb[25].mxu1  ;;  %2439 = vmatmul.mubr.f32.vlgmr.msra.gmra.mrb[16].mxu0 %v790_v15 }
 0x222   :  { %v2900_v44 = vpop.eup %2899  ;;  %v607_v22 = vadd.f32 %v3486_v11, %v606_v9  ;;  %2777 = vmatpush3.bf16.msra.mxu0 %v3483_v59  ;;  %v792_v49 = vsel %vm447_vm1, %v728_v45, %v2898_v40  ;;  %v2786_v59 = vpack.c.bf16 %v1414_v51, %v1413_v50 }
 0x223   :  { %2909 = vtanh.f32 %v3504_v43  ;;  %v791_v46 = vsel %vm447_vm1, %v727_v41, %v2900_v44  ;;  %2779 = vmatprep.subr.bf16.mxu0 %v2778_v2  ;;  %v734_v26 = vmax.f32 %v3504_v43, 0.0 }
 0x224   :  { %2911 = vtanh.f32 %v607_v22  ;;  %v2375_v47 = vpop.f32.mrb[26].mxu1  ;;  %2441 = vmatprep.mubr.f32.mxu0 %v791_v46  ;;  %v733_v20 = vmax.f32 %v607_v22, 0.0 }
 0x225   :  { %v2902_v19 = vpop.eup %2901  ;;  %v3514_v54 = vadd.f32 %v2375_v47, %v3486_v11  ;;  %v616_v30 = vpop.f32.mrb[27].mxu1  ;;  %2442 = vmatmul.mubr.f32.gmra.mrb[18].mxu0 %v792_v49 }
 0x226   :  { %v2904_v55 = vpop.eup %2903  ;;  %v617_v57 = vadd.f32 %v3486_v11, %v616_v30  ;;  %2781 = vmatpush3.bf16.msra.mxu0 %v2778_v2  ;;  %v794_v61 = vsel %vm447_vm1, %v730_v56, %v2902_v19 }
 0x227   :  { %2913 = vtanh.f32 %v3514_v54  ;;  %v793_v58 = vsel %vm447_vm1, %v729_v52, %v2904_v55  ;;  %2783 = vmatprep.subr.bf16.mxu0 %v2782_v10  ;;  %v736_v62 = vmax.f32 %v3514_v54, 0.0 }
 0x228   :  { %2915 = vtanh.f32 %v617_v57  ;;  %v2378_v25 = vpop.f32.mrb[28].mxu1  ;;  %2444 = vmatprep.mubr.f32.mxu0 %v793_v58  ;;  %v735_v32 = vmax.f32 %v617_v57, 0.0 }
 0x229   :  { %v2906_v0 = vpop.eup %2905  ;;  %v3523_v4 = vadd.f32 %v2378_v25, %v3486_v11  ;;  %v626_v6 = vpop.f32.mrb[29].mxu1  ;;  %2445 = vmatmul.mubr.f32.gmra.mrb[20].mxu0 %v794_v61 }
 0x22a   :  { %v2908_v37 = vpop.eup %2907  ;;  %v627_v53 = vadd.f32 %v3486_v11, %v626_v6  ;;  %2785 = vmatpush3.bf16.msra.mxu0 %v2782_v10  ;;  %v796_v16 = vsel %vm447_vm1, %v732_v7, %v2906_v0 }
 0x22b   :  { %2917 = vtanh.f32 %v3523_v4  ;;  %v795_v8 = vsel %vm447_vm1, %v731_v1, %v2908_v37  ;;  %2787 = vmatprep.subr.bf16.mxu0 %v2786_v59  ;;  %v738_v9 = vmax.f32 %v3523_v4, 0.0 }
 0x22c   :  { %2919 = vtanh.f32 %v627_v53  ;;  %v2381_v13 = vpop.f32.mrb[30].mxu1  ;;  %2447 = vmatprep.mubr.f32.mxu0 %v795_v8  ;;  %v737_v39 = vmax.f32 %v627_v53, 0.0 }
 0x22d   :  { %v2910_v3 = vpop.eup %2909  ;;  %v642_v21 = vadd.f32 %v2381_v13, %v3486_v11  ;;  %v636_v23 = vpop.f32.mrb[31].mxu1  ;;  %2448 = vmatmul.mubr.f32.gmra.mrb[22].mxu0 %v796_v16 }
 0x22e   :  { %v2912_v24 = vpop.eup %2911  ;;  %v637_v60 = vadd.f32 %v3486_v11, %v636_v23  ;;  %2789 = vmatpush3.bf16.msra.mxu0 %v2786_v59  ;;  %v798_v29 = vsel %vm447_vm1, %v734_v26, %v2910_v3 }
 0x22f   :  { %2921 = vtanh.f32 %v642_v21  ;;  %v797_v27 = vsel %vm447_vm1, %v733_v20, %v2912_v24  ;;  %2791 = vmatprep.subr.bf16.mxu0 %v2790_v12  ;;  %v740_v19 = vmax.f32 %v642_v21, 0.0 }
 0x230   :  { %2923 = vtanh.f32 %v637_v60  ;;  %v2384_v28 = vpop.f32.mrb[32].mxu1  ;;  %2450 = vmatprep.mubr.f32.mxu0 %v797_v27  ;;  %v739_v47 = vmax.f32 %v637_v60, 0.0 }
 0x231   :  { %v2914_v31 = vpop.eup %2913  ;;  %v652_v33 = vadd.f32 %v2384_v28, %v3486_v11  ;;  %v646_v34 = vpop.f32.mrb[33].mxu1  ;;  %2451 = vmatmul.mubr.f32.gmra.mrb[24].mxu0 %v798_v29 }
 0x232   :  { %v2916_v35 = vpop.eup %2915  ;;  %v647_v14 = vadd.f32 %v3486_v11, %v646_v34  ;;  %2793 = vmatpush3.bf16.msra.mxu0 %v2790_v12  ;;  %v800_v15 = vsel %vm447_vm1, %v736_v62, %v2914_v31 }
 0x233   :  { %2925 = vtanh.f32 %v652_v33  ;;  %v799_v2 = vsel %vm447_vm1, %v735_v32, %v2916_v35  ;;  %2795 = vmatprep.subr.bf16.mxu0 %v2794_v5  ;;  %v742_v61 = vmax.f32 %v652_v33, 0.0 }
 0x234   :  { %2927 = vtanh.f32 %v647_v14  ;;  %v2387_v36 = vpop.f32.mrb[34].mxu1  ;;  %2453 = vmatprep.mubr.f32.mxu0 %v799_v2  ;;  %v741_v57 = vmax.f32 %v647_v14, 0.0 }
 0x235   :  { %v2918_v38 = vpop.eup %2917  ;;  %v662_v40 = vadd.f32 %v2387_v36, %v3486_v11  ;;  %v656_v41 = vpop.f32.mrb[35].mxu1  ;;  %2454 = vmatmul.mubr.f32.gmra.mrb[26].mxu0 %v800_v15 }
 0x236   :  { %v2920_v43 = vpop.eup %2919  ;;  %v657_v44 = vadd.f32 %v3486_v11, %v656_v41  ;;  %2797 = vmatpush3.bf16.msra.mxu0 %v2794_v5  ;;  %v802_v46 = vsel %vm447_vm1, %v738_v9, %v2918_v38 }
 0x237   :  { %2929 = vtanh.f32 %v662_v40  ;;  %v801_v45 = vsel %vm447_vm1, %v737_v39, %v2920_v43  ;;  %v744_v8 = vmax.f32 %v662_v40, 0.0 }
 0x238   :  { %2931 = vtanh.f32 %v657_v44  ;;  %v2390_v22 = vpop.f32.mrb[36].mxu1  ;;  %2456 = vmatprep.mubr.f32.mxu0 %v801_v45  ;;  %v743_v6 = vmax.f32 %v657_v44, 0.0 }
 0x239   :  { %v2922_v10 = vpop.eup %2921  ;;  %v672_v49 = vadd.f32 %v2390_v22, %v3486_v11  ;;  %v666_v50 = vpop.f32.mrb[37].mxu1  ;;  %2457 = vmatmul.mubr.f32.gmra.mrb[28].mxu0 %v802_v46 }
 0x23a   :  { %v2924_v51 = vpop.eup %2923  ;;  %v667_v52 = vadd.f32 %v3486_v11, %v666_v50  ;;  %v804_v55 = vsel %vm447_vm1, %v740_v19, %v2922_v10 }
 0x23b   :  { %2933 = vtanh.f32 %v672_v49  ;;  %v803_v54 = vsel %vm447_vm1, %v739_v47, %v2924_v51  ;;  %v746_v24 = vmax.f32 %v672_v49, 0.0 }
 0x23c   :  { %2935 = vtanh.f32 %v667_v52  ;;  %v2393_v30 = vpop.f32.mrb[38].mxu1  ;;  %2459 = vmatprep.mubr.f32.mxu0 %v803_v54  ;;  %v745_v3 = vmax.f32 %v667_v52, 0.0 }
 0x23d   :  { %v2926_v56 = vpop.eup %2925  ;;  %v682_v58 = vadd.f32 %v2393_v30, %v3486_v11  ;;  %v676_v59 = vpop.f32.mrb[39].mxu1  ;;  %2460 = vmatmul.mubr.f32.gmra.mrb[30].mxu0 %v804_v55 }
 0x23e   :  { %v2928_v25 = vpop.eup %2927  ;;  %v677_v42 = vadd.f32 %v3486_v11, %v676_v59  ;;  %v806_v1 = vsel %vm447_vm1, %v742_v61, %v2926_v56  ;;  %v1171_v61 = vld [vmem:[#allocation5 + $0x1c8] sm:$0xff] }
 0x23f   :  { %2937 = vtanh.f32 %v682_v58  ;;  %v805_v63 = vsel %vm447_vm1, %v741_v57, %v2928_v25  ;;  %v748_v34 = vmax.f32 %v682_v58, 0.0  ;;  %v1170_v25 = vld [vmem:[#allocation5 + $0x1c0] sm:$0xff] }
 0x240   :  { %2939 = vtanh.f32 %v677_v42  ;;  %v2396_v0 = vpop.f32.mrb[40].mxu1  ;;  %2462 = vmatprep.mubr.f32.mxu0 %v805_v63  ;;  %v747_v29 = vmax.f32 %v677_v42, 0.0  ;;  %v2758_v42 = vpack.c.bf16 %v1171_v61, %v1170_v25  ;;  %v1172_v63 = vld [vmem:[#allocation5 + $0x1d0] sm:$0xff] }
 0x241   :  { %v2930_v4 = vpop.eup %2929  ;;  %v692_v37 = vadd.f32 %v2396_v0, %v3486_v11  ;;  %v686_v7 = vpop.f32.mrb[41].mxu1  ;;  %2463 = vmatmul.mubr.f32.gmra.mrb[32].mxu0 %v806_v1  ;;  %v1173_v0 = vld [vmem:[#allocation5 + $0x1d8] sm:$0xff]  ;;  %v1419_v1 = vld [vmem:[#allocation5 + $0x260] sm:$0xff] }
 0x242   :  { %v2932_v53 = vpop.eup %2931  ;;  %v687_v12 = vadd.f32 %v3486_v11, %v686_v7  ;;  %v808_v48 = vsel %vm447_vm1, %v744_v8, %v2930_v4  ;;  %2759 = vmatprep.subr.bf16.mxu1 %v2758_v42  ;;  %v1420_v4 = vld [vmem:[#allocation5 + $0x268] sm:$0xff]  ;;  %v1174_v7 = vld [vmem:[#allocation5 + $0x1e0] sm:$0xff] }
 0x243   :  { %2941 = vtanh.f32 %v692_v37  ;;  %v807_v13 = vsel %vm447_vm1, %v743_v6, %v2932_v53  ;;  %v750_v41 = vmax.f32 %v692_v37, 0.0  ;;  %2761 = vmatpush3.bf16.msra.mxu1 %v2758_v42  ;;  %v2762_v6 = vpack.c.bf16 %v1173_v0, %v1172_v63  ;;  %v1175_v53 = vld [vmem:[#allocation5 + $0x1e8] sm:$0xff] }
 0x244   :  { %2943 = vtanh.f32 %v687_v12  ;;  %v2399_v16 = vpop.f32.mrb[42].mxu1  ;;  %2465 = vmatprep.mubr.f32.mxu0 %v807_v13  ;;  %v749_v15 = vmax.f32 %v687_v12, 0.0  ;;  %v2798_v37 = vpack.c.bf16 %v1420_v4, %v1419_v1  ;;  %v2766_v8 = vpack.c.bf16 %v1175_v53, %v1174_v7  ;;  %v1421_v12 = vld [vmem:[#allocation5 + $0x270] sm:$0xff]  ;;  %v1422_v13 = vld [vmem:[#allocation5 + $0x278] sm:$0xff] }
 0x245   :  { %v2934_v17 = vpop.eup %2933  ;;  %v702_v20 = vadd.f32 %v2399_v16, %v3486_v11  ;;  %v696_v21 = vpop.f32.mrb[43].mxu1  ;;  %2466 = vmatmul.mubr.f32.gmra.mrb[34].mxu0 %v808_v48  ;;  %2763 = vmatprep.subr.bf16.mxu1 %v2762_v6  ;;  %v1176_v16 = vld [vmem:[#allocation5 + $0x1f0] sm:$0xff]  ;;  %v2802_v48 = vpack.c.bf16 %v1422_v13, %v1421_v12 }
 0x246   :  { %v2936_v23 = vpop.eup %2935  ;;  %v697_v26 = vadd.f32 %v3486_v11, %v696_v21  ;;  %v810_v5 = vsel %vm447_vm1, %v746_v24, %v2934_v17  ;;  %2799 = vmatprep.subr.bf16.mxu0 %v2798_v37  ;;  %v1177_v17 = vld [vmem:[#allocation5 + $0x1f8] sm:$0xff] }
 0x247   :  { %2945 = vtanh.f32 %v702_v20  ;;  %v809_v60 = vsel %vm447_vm1, %v745_v3, %v2936_v23  ;;  %v752_v10 = vmax.f32 %v702_v20, 0.0  ;;  %2765 = vmatpush3.bf16.msra.mxu1 %v2762_v6  ;;  %2801 = vmatpush3.bf16.msra.mxu0 %v2798_v37  ;;  %v2770_v3 = vpack.c.bf16 %v1177_v17, %v1176_v16  ;;  %v3601_v20 = vld [vmem:[#allocation7 + $0x2] ss:$0 sm:$0xff] }
 0x248   :  { %2947 = vtanh.f32 %v697_v26  ;;  %v2402_v27 = vpop.f32.mrb[44].mxu1  ;;  %2468 = vmatprep.mubr.f32.mxu0 %v809_v60  ;;  %v751_v22 = vmax.f32 %v697_v26, 0.0  ;;  %2767 = vmatprep.subr.bf16.mxu1 %v2766_v8 }
 0x249   :  { %v2938_v28 = vpop.eup %2937  ;;  %v712_v31 = vadd.f32 %v2402_v27, %v3486_v11  ;;  %v706_v32 = vpop.f32.mrb[45].mxu1  ;;  %2469 = vmatmul.mubr.f32.gmra.mrb[36].mxu0 %v810_v5  ;;  %2803 = vmatprep.subr.bf16.mxu0 %v2802_v48 }
 0x24a   :  { %v2940_v33 = vpop.eup %2939  ;;  %v707_v35 = vadd.f32 %v3486_v11, %v706_v32  ;;  %v812_v2 = vsel %vm447_vm1, %v748_v34, %v2938_v28 }
 0x24b   :  { %2949 = vtanh.f32 %v712_v31  ;;  %v811_v62 = vsel %vm447_vm1, %v747_v29, %v2940_v33  ;;  %v754_v19 = vmax.f32 %v712_v31, 0.0  ;;  %2769 = vmatpush3.bf16.msra.mxu1 %v2766_v8  ;;  %2805 = vmatpush3.bf16.msra.mxu0 %v2802_v48 }
 0x24c   :  { %2951 = vtanh.f32 %v707_v35  ;;  %v2405_v14 = vpop.f32.mrb[46].mxu1  ;;  %2471 = vmatprep.mubr.f32.mxu0 %v811_v62  ;;  %v753_v50 = vmax.f32 %v707_v35, 0.0  ;;  %2771 = vmatprep.subr.bf16.mxu1 %v2770_v3 }
 0x24d   :  { %v2942_v36 = vpop.eup %2941  ;;  %v722_v38 = vadd.f32 %v2405_v14, %v3486_v11  ;;  %v716_v39 = vpop.f32.mrb[47].mxu1  ;;  %2472 = vmatmul.mubr.f32.gmra.mrb[38].mxu0 %v812_v2 }
 0x24e   :  { %v2944_v40 = vpop.eup %2943  ;;  %v717_v43 = vadd.f32 %v3486_v11, %v716_v39  ;;  %v814_v44 = vsel %vm447_vm1, %v750_v41, %v2942_v36 }
 0x24f   :  { %2953 = vtanh.f32 %v722_v38  ;;  %v813_v9 = vsel %vm447_vm1, %v749_v15, %v2944_v40  ;;  %v756_v57 = vmax.f32 %v722_v38, 0.0  ;;  %2773 = vmatpush3.bf16.msra.mxu1 %v2770_v3 }
 0x250   :  { %2955 = vtanh.f32 %v717_v43  ;;  %2474 = vmatprep.mubr.f32.mxu0 %v813_v9  ;;  %v755_v55 = vmax.f32 %v717_v43, 0.0 }
 0x251   :  { %v2946_v45 = vpop.eup %2945  ;;  %2475 = vmatmul.mubr.f32.gmra.mrb[40].mxu0 %v814_v44 }
 0x252   :  { %v2948_v46 = vpop.eup %2947  ;;  %v816_v11 = vsel %vm447_vm1, %v752_v10, %v2946_v45 }
 0x253   :  { %v815_v47 = vsel %vm447_vm1, %v751_v22, %v2948_v46 }
 0x254   :  { %2477 = vmatprep.mubr.f32.mxu0 %v815_v47 }
 0x255   :  { %v2950_v49 = vpop.eup %2949  ;;  %2478 = vmatmul.mubr.f32.gmra.mrb[42].mxu0 %v816_v11 }
 0x256   :  { %v2952_v51 = vpop.eup %2951  ;;  %v818_v54 = vsel %vm447_vm1, %v754_v19, %v2950_v49 }
 0x257   :  { %v817_v52 = vsel %vm447_vm1, %v753_v50, %v2952_v51 }
 0x258   :  { %2480 = vmatprep.mubr.f32.mxu0 %v817_v52 }
 0x259   :  { %v2954_v30 = vpop.eup %2953  ;;  %2481 = vmatmul.mubr.f32.gmra.mrb[44].mxu0 %v818_v54 }
 0x25a   :  { %v2956_v56 = vpop.eup %2955  ;;  %v820_v59 = vsel %vm447_vm1, %v756_v57, %v2954_v30 }
 0x25b   :  { %v819_v58 = vsel %vm447_vm1, %v755_v55, %v2956_v56 }
 0x25c   :  { %2483 = vmatprep.mubr.f32.mxu0 %v819_v58 }
 0x25d   :  { %2484 = vmatmul.mubr.f32.gmra.mrb[46].mxu0 %v820_v59 }
 0x2f4   :  { %v2440_v21 = vpop.f32.mrb[16].mxu0 }
 0x2f5   :  { %v913_v23 = vadd.f32 %v2440_v21, %v3601_v20  ;;  %v907_v24 = vpop.f32.mrb[17].mxu0 }
 0x2f6   :  { %v908_v26 = vadd.f32 %v3601_v20, %v907_v24 }
 0x2f7   :  { %2957 = vtanh.f32 %v913_v23  ;;  %v1067_v15 = vmax.f32 %v913_v23, 0.0 }
 0x2f8   :  { %2959 = vtanh.f32 %v908_v26  ;;  %v2443_v60 = vpop.f32.mrb[18].mxu0  ;;  %v1066_v62 = vmax.f32 %v908_v26, 0.0 }
 0x2f9   :  { %v923_v27 = vadd.f32 %v2443_v60, %v3601_v20  ;;  %v917_v5 = vpop.f32.mrb[19].mxu0 }
 0x2fa   :  { %v918_v28 = vadd.f32 %v3601_v20, %v917_v5 }
 0x2fb   :  { %2961 = vtanh.f32 %v923_v27  ;;  %v1069_v46 = vmax.f32 %v923_v27, 0.0 }
 0x2fc   :  { %2963 = vtanh.f32 %v918_v28  ;;  %v2446_v29 = vpop.f32.mrb[20].mxu0  ;;  %v1068_v9 = vmax.f32 %v918_v28, 0.0 }
 0x2fd   :  { %v933_v31 = vadd.f32 %v2446_v29, %v3601_v20  ;;  %v927_v32 = vpop.f32.mrb[21].mxu0 }
 0x2fe   :  { %v928_v33 = vadd.f32 %v3601_v20, %v927_v32 }
 0x2ff   :  { %2965 = vtanh.f32 %v933_v31  ;;  %v1071_v30 = vmax.f32 %v933_v31, 0.0 }
 0x300   :  { %2967 = vtanh.f32 %v928_v33  ;;  %v2449_v34 = vpop.f32.mrb[22].mxu0  ;;  %v1070_v51 = vmax.f32 %v928_v33, 0.0 }
 0x301   :  { %v2958_v35 = vpop.eup %2957  ;;  %v943_v14 = vadd.f32 %v2449_v34, %v3601_v20  ;;  %v937_v2 = vpop.f32.mrb[23].mxu0 }
 0x302   :  { %v2960_v36 = vpop.eup %2959  ;;  %v938_v38 = vadd.f32 %v3601_v20, %v937_v2  ;;  %v1131_v41 = vsel %vm447_vm1, %v1067_v15, %v2958_v35 }
 0x303   :  { %2969 = vtanh.f32 %v943_v14  ;;  %v1130_v39 = vsel %vm447_vm1, %v1066_v62, %v2960_v36  ;;  %v1073_v0 = vmax.f32 %v943_v14, 0.0 }
 0x304   :  { %2971 = vtanh.f32 %v938_v38  ;;  %v2452_v40 = vpop.f32.mrb[24].mxu0  ;;  %2518 = vmatprep.mubr.f32.mxu1 %v1130_v39  ;;  %2598 = vmatprep.mubr.f32.mxu0 %v1130_v39  ;;  %v1072_v25 = vmax.f32 %v938_v38, 0.0 }
 0x305   :  { %v2962_v43 = vpop.eup %2961  ;;  %v3616_v44 = vadd.f32 %v2452_v40, %v3601_v20  ;;  %v947_v45 = vpop.f32.mrb[25].mxu0  ;;  %2519 = vmatmul.mubr.f32.vlgmr.msra.gmra.mrb[48].mxu1 %v1131_v41  ;;  %2599 = vmatmul.mubr.f32.vlgmr.msra.gmra.mrb[48].mxu0 %v1131_v41 }
 0x306   :  { %v2964_v22 = vpop.eup %2963  ;;  %v948_v10 = vadd.f32 %v3601_v20, %v947_v45  ;;  %v1133_v49 = vsel %vm447_vm1, %v1069_v46, %v2962_v43 }
 0x307   :  { %2973 = vtanh.f32 %v3616_v44  ;;  %v1132_v47 = vsel %vm447_vm1, %v1068_v9, %v2964_v22  ;;  %v1075_v16 = vmax.f32 %v3616_v44, 0.0 }
 0x308   :  { %2975 = vtanh.f32 %v948_v10  ;;  %v2455_v11 = vpop.f32.mrb[26].mxu0  ;;  %2521 = vmatprep.mubr.f32.mxu1 %v1132_v47  ;;  %2601 = vmatprep.mubr.f32.mxu0 %v1132_v47  ;;  %v1074_v53 = vmax.f32 %v948_v10, 0.0 }
 0x309   :  { %v2966_v50 = vpop.eup %2965  ;;  %v3625_v19 = vadd.f32 %v2455_v11, %v3601_v20  ;;  %v957_v52 = vpop.f32.mrb[27].mxu0  ;;  %2522 = vmatmul.mubr.f32.gmra.mrb[50].mxu1 %v1133_v49  ;;  %2602 = vmatmul.mubr.f32.gmra.mrb[50].mxu0 %v1133_v49 }
 0x30a   :  { %v2968_v54 = vpop.eup %2967  ;;  %v958_v55 = vadd.f32 %v3601_v20, %v957_v52  ;;  %v1135_v58 = vsel %vm447_vm1, %v1071_v30, %v2966_v50 }
 0x30b   :  { %2977 = vtanh.f32 %v3625_v19  ;;  %v1134_v56 = vsel %vm447_vm1, %v1070_v51, %v2968_v54  ;;  %v1077_v5 = vmax.f32 %v3625_v19, 0.0 }
 0x30c   :  { %2979 = vtanh.f32 %v958_v55  ;;  %v2458_v57 = vpop.f32.mrb[28].mxu0  ;;  %2524 = vmatprep.mubr.f32.mxu1 %v1134_v56  ;;  %2604 = vmatprep.mubr.f32.mxu0 %v1134_v56  ;;  %v1076_v24 = vmax.f32 %v958_v55, 0.0 }
 0x30d   :  { %v2970_v59 = vpop.eup %2969  ;;  %v3634_v61 = vadd.f32 %v2458_v57, %v3601_v20  ;;  %v967_v42 = vpop.f32.mrb[29].mxu0  ;;  %2525 = vmatmul.mubr.f32.gmra.mrb[52].mxu1 %v1135_v58  ;;  %2605 = vmatmul.mubr.f32.gmra.mrb[52].mxu0 %v1135_v58 }
 0x30e   :  { %v2972_v63 = vpop.eup %2971  ;;  %v968_v1 = vadd.f32 %v3601_v20, %v967_v42  ;;  %v1137_v37 = vsel %vm447_vm1, %v1073_v0, %v2970_v59 }
 0x30f   :  { %2981 = vtanh.f32 %v3634_v61  ;;  %v1136_v4 = vsel %vm447_vm1, %v1072_v25, %v2972_v63  ;;  %v1079_v2 = vmax.f32 %v3634_v61, 0.0 }
 0x310   :  { %2983 = vtanh.f32 %v968_v1  ;;  %v2461_v6 = vpop.f32.mrb[30].mxu0  ;;  %2527 = vmatprep.mubr.f32.mxu1 %v1136_v4  ;;  %2607 = vmatprep.mubr.f32.mxu0 %v1136_v4  ;;  %v1078_v34 = vmax.f32 %v968_v1, 0.0 }
 0x311   :  { %v2974_v7 = vpop.eup %2973  ;;  %v3643_v8 = vadd.f32 %v2461_v6, %v3601_v20  ;;  %v977_v12 = vpop.f32.mrb[31].mxu0  ;;  %2528 = vmatmul.mubr.f32.gmra.mrb[54].mxu1 %v1137_v37  ;;  %2608 = vmatmul.mubr.f32.gmra.mrb[54].mxu0 %v1137_v37 }
 0x312   :  { %v2976_v13 = vpop.eup %2975  ;;  %v978_v48 = vadd.f32 %v3601_v20, %v977_v12  ;;  %v1139_v21 = vsel %vm447_vm1, %v1075_v16, %v2974_v7 }
 0x313   :  { %2985 = vtanh.f32 %v3643_v8  ;;  %v1138_v17 = vsel %vm447_vm1, %v1074_v53, %v2976_v13  ;;  %v1081_v45 = vmax.f32 %v3643_v8, 0.0 }
 0x314   :  { %2987 = vtanh.f32 %v978_v48  ;;  %v2464_v3 = vpop.f32.mrb[32].mxu0  ;;  %2530 = vmatprep.mubr.f32.mxu1 %v1138_v17  ;;  %2610 = vmatprep.mubr.f32.mxu0 %v1138_v17  ;;  %v1080_v41 = vmax.f32 %v978_v48, 0.0 }
 0x315   :  { %v2978_v23 = vpop.eup %2977  ;;  %v3653_v26 = vadd.f32 %v2464_v3, %v3601_v20  ;;  %v987_v60 = vpop.f32.mrb[33].mxu0  ;;  %2531 = vmatmul.mubr.f32.gmra.mrb[56].mxu1 %v1139_v21  ;;  %2611 = vmatmul.mubr.f32.gmra.mrb[56].mxu0 %v1139_v21 }
 0x316   :  { %v2980_v27 = vpop.eup %2979  ;;  %v988_v28 = vadd.f32 %v3601_v20, %v987_v60  ;;  %v1141_v32 = vsel %vm447_vm1, %v1077_v5, %v2978_v23 }
 0x317   :  { %2989 = vtanh.f32 %v3653_v26  ;;  %v1140_v29 = vsel %vm447_vm1, %v1076_v24, %v2980_v27  ;;  %v1083_v52 = vmax.f32 %v3653_v26, 0.0 }
 0x318   :  { %2991 = vtanh.f32 %v988_v28  ;;  %v2467_v31 = vpop.f32.mrb[34].mxu0  ;;  %2533 = vmatprep.mubr.f32.mxu1 %v1140_v29  ;;  %2613 = vmatprep.mubr.f32.mxu0 %v1140_v29  ;;  %v1082_v49 = vmax.f32 %v988_v28, 0.0 }
 0x319   :  { %v2982_v33 = vpop.eup %2981  ;;  %v3663_v35 = vadd.f32 %v2467_v31, %v3601_v20  ;;  %v997_v62 = vpop.f32.mrb[35].mxu0  ;;  %2534 = vmatmul.mubr.f32.gmra.mrb[58].mxu1 %v1141_v32  ;;  %2614 = vmatmul.mubr.f32.gmra.mrb[58].mxu0 %v1141_v32 }
 0x31a   :  { %v2984_v14 = vpop.eup %2983  ;;  %v998_v36 = vadd.f32 %v3601_v20, %v997_v62  ;;  %v1143_v39 = vsel %vm447_vm1, %v1079_v2, %v2982_v33 }
 0x31b   :  { %2993 = vtanh.f32 %v3663_v35  ;;  %v1142_v15 = vsel %vm447_vm1, %v1078_v34, %v2984_v14  ;;  %v1085_v42 = vmax.f32 %v3663_v35, 0.0 }
 0x31c   :  { %2995 = vtanh.f32 %v998_v36  ;;  %v2470_v38 = vpop.f32.mrb[36].mxu0  ;;  %2536 = vmatprep.mubr.f32.mxu1 %v1142_v15  ;;  %2616 = vmatprep.mubr.f32.mxu0 %v1142_v15  ;;  %v1084_v58 = vmax.f32 %v998_v36, 0.0 }
 0x31d   :  { %v2986_v40 = vpop.eup %2985  ;;  %v3673_v43 = vadd.f32 %v2470_v38, %v3601_v20  ;;  %v1007_v9 = vpop.f32.mrb[37].mxu0  ;;  %2537 = vmatmul.mubr.f32.gmra.mrb[60].mxu1 %v1143_v39  ;;  %2617 = vmatmul.mubr.f32.gmra.mrb[60].mxu0 %v1143_v39 }
 0x31e   :  { %v2988_v44 = vpop.eup %2987  ;;  %v1008_v22 = vadd.f32 %v3601_v20, %v1007_v9  ;;  %v1145_v47 = vsel %vm447_vm1, %v1081_v45, %v2986_v40 }
 0x31f   :  { %2997 = vtanh.f32 %v3673_v43  ;;  %v1144_v46 = vsel %vm447_vm1, %v1080_v41, %v2988_v44  ;;  %v1087_v12 = vmax.f32 %v3673_v43, 0.0 }
 0x320   :  { %2999 = vtanh.f32 %v1008_v22  ;;  %v2473_v10 = vpop.f32.mrb[38].mxu0  ;;  %2539 = vmatprep.mubr.f32.mxu1 %v1144_v46  ;;  %2619 = vmatprep.mubr.f32.mxu0 %v1144_v46  ;;  %v1086_v37 = vmax.f32 %v1008_v22, 0.0 }
 0x321   :  { %v2990_v11 = vpop.eup %2989  ;;  %v3683_v50 = vadd.f32 %v2473_v10, %v3601_v20  ;;  %v1017_v51 = vpop.f32.mrb[39].mxu0  ;;  %2540 = vmatmul.mubr.f32.gmra.mrb[62].mxu1 %v1145_v47  ;;  %2620 = vmatmul.mubr.f32.gmra.mrb[62].mxu0 %v1145_v47 }
 0x322   :  { %v2992_v19 = vpop.eup %2991  ;;  %v1018_v54 = vadd.f32 %v3601_v20, %v1017_v51  ;;  %v1147_v56 = vsel %vm447_vm1, %v1083_v52, %v2990_v11  ;;  %v3733_v52 = vld [vmem:[#allocation7 + $0x6] ss:$0 sm:$0xff] }
 0x323   :  { %3001 = vtanh.f32 %v3683_v50  ;;  %v1146_v30 = vsel %vm447_vm1, %v1082_v49, %v2992_v19  ;;  %v1089_v60 = vmax.f32 %v3683_v50, 0.0  ;;  %v3731_v19 = vld [vmem:[#allocation7 + $0x4] ss:$0 sm:$0xff] }
 0x324   :  { %3003 = vtanh.f32 %v1018_v54  ;;  %v2476_v55 = vpop.f32.mrb[40].mxu0  ;;  %2542 = vmatprep.mubr.f32.mxu1 %v1146_v30  ;;  %2622 = vmatprep.mubr.f32.mxu0 %v1146_v30  ;;  %v1088_v21 = vmax.f32 %v1018_v54, 0.0 }
 0x325   :  { %v2994_v57 = vpop.eup %2993  ;;  %v1033_v59 = vadd.f32 %v2476_v55, %v3601_v20  ;;  %v1027_v25 = vpop.f32.mrb[41].mxu0  ;;  %2543 = vmatmul.mubr.f32.gmra.mrb[64].mxu1 %v1147_v56  ;;  %2623 = vmatmul.mubr.f32.gmra.mrb[64].mxu0 %v1147_v56 }
 0x326   :  { %v2996_v61 = vpop.eup %2995  ;;  %v1028_v63 = vadd.f32 %v3601_v20, %v1027_v25  ;;  %v1149_v4 = vsel %vm447_vm1, %v1085_v42, %v2994_v57 }
 0x327   :  { %3005 = vtanh.f32 %v1033_v59  ;;  %v1148_v0 = vsel %vm447_vm1, %v1084_v58, %v2996_v61  ;;  %v1091_v62 = vmax.f32 %v1033_v59, 0.0 }
 0x328   :  { %3007 = vtanh.f32 %v1028_v63  ;;  %v2479_v1 = vpop.f32.mrb[42].mxu0  ;;  %2545 = vmatprep.mubr.f32.mxu1 %v1148_v0  ;;  %2625 = vmatprep.mubr.f32.mxu0 %v1148_v0  ;;  %v1090_v32 = vmax.f32 %v1028_v63, 0.0 }
 0x329   :  { %v2998_v6 = vpop.eup %2997  ;;  %v1043_v7 = vadd.f32 %v2479_v1, %v3601_v20  ;;  %v1037_v53 = vpop.f32.mrb[43].mxu0  ;;  %2546 = vmatmul.mubr.f32.gmra.mrb[66].mxu1 %v1149_v4  ;;  %2626 = vmatmul.mubr.f32.gmra.mrb[66].mxu0 %v1149_v4  ;;  %v3740_v4 = vld [vmem:[#allocation7 + $0x3] ss:$0 sm:$0xff] }
 0x32a   :  { %v3000_v8 = vpop.eup %2999  ;;  %v1038_v13 = vadd.f32 %v3601_v20, %v1037_v53  ;;  %v1151_v17 = vsel %vm447_vm1, %v1087_v12, %v2998_v6 }
 0x32b   :  { %3009 = vtanh.f32 %v1043_v7  ;;  %v1150_v16 = vsel %vm447_vm1, %v1086_v37, %v3000_v8  ;;  %v1093_v40 = vmax.f32 %v1043_v7, 0.0 }
 0x32c   :  { %3011 = vtanh.f32 %v1038_v13  ;;  %v2482_v48 = vpop.f32.mrb[44].mxu0  ;;  %2548 = vmatprep.mubr.f32.mxu1 %v1150_v16  ;;  %2628 = vmatprep.mubr.f32.mxu0 %v1150_v16  ;;  %v1092_v38 = vmax.f32 %v1038_v13, 0.0 }
 0x32d   :  { %v3002_v3 = vpop.eup %3001  ;;  %v1053_v23 = vadd.f32 %v2482_v48, %v3601_v20  ;;  %v1047_v24 = vpop.f32.mrb[45].mxu0  ;;  %2549 = vmatmul.mubr.f32.gmra.mrb[68].mxu1 %v1151_v17  ;;  %2629 = vmatmul.mubr.f32.gmra.mrb[68].mxu0 %v1151_v17 }
 0x32e   :  { %v3004_v26 = vpop.eup %3003  ;;  %v1048_v27 = vadd.f32 %v3601_v20, %v1047_v24  ;;  %v1153_v29 = vsel %vm447_vm1, %v1089_v60, %v3002_v3 }
 0x32f   :  { %3013 = vtanh.f32 %v1053_v23  ;;  %v1152_v5 = vsel %vm447_vm1, %v1088_v21, %v3004_v26  ;;  %v1095_v45 = vmax.f32 %v1053_v23, 0.0 }
 0x330   :  { %3015 = vtanh.f32 %v1048_v27  ;;  %v2485_v28 = vpop.f32.mrb[46].mxu0  ;;  %2551 = vmatprep.mubr.f32.mxu1 %v1152_v5  ;;  %2631 = vmatprep.mubr.f32.mxu0 %v1152_v5  ;;  %v1094_v9 = vmax.f32 %v1048_v27, 0.0 }
 0x331   :  { %v3006_v31 = vpop.eup %3005  ;;  %v1063_v33 = vadd.f32 %v2485_v28, %v3601_v20  ;;  %v1057_v34 = vpop.f32.mrb[47].mxu0  ;;  %2552 = vmatmul.mubr.f32.gmra.mrb[70].mxu1 %v1153_v29  ;;  %2632 = vmatmul.mubr.f32.gmra.mrb[70].mxu0 %v1153_v29 }
 0x332   :  { %v3008_v35 = vpop.eup %3007  ;;  %v1058_v14 = vadd.f32 %v3601_v20, %v1057_v34  ;;  %v1155_v36 = vsel %vm447_vm1, %v1091_v62, %v3006_v31 }
 0x333   :  { %3017 = vtanh.f32 %v1063_v33  ;;  %v1154_v2 = vsel %vm447_vm1, %v1090_v32, %v3008_v35  ;;  %v1097_v49 = vmax.f32 %v1063_v33, 0.0 }
 0x334   :  { %3019 = vtanh.f32 %v1058_v14  ;;  %2554 = vmatprep.mubr.f32.mxu1 %v1154_v2  ;;  %2634 = vmatprep.mubr.f32.mxu0 %v1154_v2  ;;  %v1096_v47 = vmax.f32 %v1058_v14, 0.0 }
 0x335   :  { %v3010_v15 = vpop.eup %3009  ;;  %2555 = vmatmul.mubr.f32.gmra.mrb[72].mxu1 %v1155_v36  ;;  %2635 = vmatmul.mubr.f32.gmra.mrb[72].mxu0 %v1155_v36 }
 0x336   :  { %v3012_v39 = vpop.eup %3011  ;;  %v1157_v20 = vsel %vm447_vm1, %v1093_v40, %v3010_v15 }
 0x337   :  { %v1156_v41 = vsel %vm447_vm1, %v1092_v38, %v3012_v39 }
 0x338   :  { %2557 = vmatprep.mubr.f32.mxu1 %v1156_v41  ;;  %2637 = vmatprep.mubr.f32.mxu0 %v1156_v41 }
 0x339   :  { %v3014_v43 = vpop.eup %3013  ;;  %2558 = vmatmul.mubr.f32.gmra.mrb[74].mxu1 %v1157_v20  ;;  %2638 = vmatmul.mubr.f32.gmra.mrb[74].mxu0 %v1157_v20 }
 0x33a   :  { %v3016_v44 = vpop.eup %3015  ;;  %v1159_v46 = vsel %vm447_vm1, %v1095_v45, %v3014_v43 }
 0x33b   :  { %v1158_v22 = vsel %vm447_vm1, %v1094_v9, %v3016_v44 }
 0x33c   :  { %2560 = vmatprep.mubr.f32.mxu1 %v1158_v22  ;;  %2640 = vmatprep.mubr.f32.mxu0 %v1158_v22 }
 0x33d   :  { %v3018_v10 = vpop.eup %3017  ;;  %2561 = vmatmul.mubr.f32.gmra.mrb[76].mxu1 %v1159_v46  ;;  %2641 = vmatmul.mubr.f32.gmra.mrb[76].mxu0 %v1159_v46 }
 0x33e   :  { %v3020_v11 = vpop.eup %3019  ;;  %v1161_v51 = vsel %vm447_vm1, %v1097_v49, %v3018_v10 }
 0x33f   :  { %v1160_v50 = vsel %vm447_vm1, %v1096_v47, %v3020_v11 }
 0x340   :  { %2563 = vmatprep.mubr.f32.mxu1 %v1160_v50  ;;  %2643 = vmatprep.mubr.f32.mxu0 %v1160_v50 }
 0x341   :  { %2564 = vmatmul.mubr.f32.gmra.mrb[78].mxu1 %v1161_v51  ;;  %2644 = vmatmul.mubr.f32.gmra.mrb[78].mxu0 %v1161_v51 }
 0x3d8   :  { %v2520_v54 = vpop.f32.mrb[48].mxu1  ;;  %v2600_v30 = vpop.f32.mrb[48].mxu0 }
 0x3d9   :  { %v1499_v55 = vadd.f32 %v2600_v30, %v3731_v19  ;;  %v1248_v56 = vpop.f32.mrb[49].mxu1  ;;  %v1493_v57 = vpop.f32.mrb[49].mxu0  ;;  %v1254_v13 = vadd.f32 %v2520_v54, %v3740_v4  ;;  %v3085_v30 = vld [vmem:[#allocation2 + $0x8] sm:$0xff] }
 0x3da   :  { %v1494_v58 = vadd.f32 %v3731_v19, %v1493_v57  ;;  %v1249_v21 = vadd.f32 %v3740_v4, %v1248_v56 }
 0x3db   :  { %v1689_v59 = vmul.f32 %v3733_v52, %v1499_v55  ;;  %v1657_v33 = vmul.f32 %v3733_v52, %v1254_v13 }
 0x3dc   :  { %v2523_v25 = vpop.f32.mrb[50].mxu1  ;;  %v2603_v61 = vpop.f32.mrb[50].mxu0  ;;  %v1688_v18 = vmul.f32 %v3733_v52, %v1494_v58  ;;  %v1656_v36 = vmul.f32 %v3733_v52, %v1249_v21 }
 0x3dd   :  { %v1509_v42 = vadd.f32 %v2603_v61, %v3731_v19  ;;  %1882 = vadd.xlane.f32.xlu0 %v1689_v59  ;;  %v1722_v63 = vmul.f32 1.442695, %v1689_v59  ;;  %v1258_v0 = vpop.f32.mrb[51].mxu1  ;;  %v1503_v1 = vpop.f32.mrb[51].mxu0  ;;  %v1264_v26 = vadd.f32 %v2523_v25, %v3740_v4  ;;  %v3086_v59 = vld [vmem:[#allocation2] sm:$0xff] }
 0x3de   :  { %v1504_v6 = vadd.f32 %v3731_v19, %v1503_v1  ;;  %v1720_v37 = vmul.f32 1.442695, %v1688_v18  ;;  %v1259_v60 = vadd.f32 %v3740_v4, %v1258_v0 }
 0x3df   :  { %3021 = vpow2.f32 %v1722_v63  ;;  %v1691_v7 = vmul.f32 %v3733_v52, %v1509_v42  ;;  %v1659_v40 = vmul.f32 %v3733_v52, %v1264_v26  ;;  %v3088_v26 = vld [vmem:[#allocation2 + $0x10] sm:$0xff] }
 0x3e0   :  { %v2526_v53 = vpop.f32.mrb[52].mxu1  ;;  %v2606_v8 = vpop.f32.mrb[52].mxu0  ;;  %3023 = vpow2.f32 %v1720_v37  ;;  %v1690_v12 = vmul.f32 %v3733_v52, %v1504_v6  ;;  %v3763_v41 = vmul.f32 %v3733_v52, %v1259_v60 }
 0x3e1   :  { %v1519_v16 = vadd.f32 %v2606_v8, %v3731_v19  ;;  %1886 = vadd.xlane.f32.xlu1 %v1691_v7  ;;  %v1726_v48 = vmul.f32 1.442695, %v1691_v7  ;;  %v1513_v17 = vpop.f32.mrb[53].mxu0  ;;  %1880 = vadd.xlane.f32.xlu0 %v1688_v18  ;;  %v1268_v3 = vpop.f32.mrb[53].mxu1  ;;  %v1274_v5 = vadd.f32 %v2526_v53, %v3740_v4 }
 0x3e2   :  { %v1514_v23 = vadd.f32 %v3731_v19, %v1513_v17  ;;  %v1724_v24 = vmul.f32 1.442695, %v1690_v12  ;;  %v1269_v28 = vadd.f32 %v3740_v4, %v1268_v3  ;;  %v3087_v17 = vld [vmem:[#allocation2 + $0x18] sm:$0xff] }
 0x3e3   :  { %3025 = vpow2.f32 %v1726_v48  ;;  %v1693_v27 = vmul.f32 %v3733_v52, %v1519_v16  ;;  %v3767_v43 = vmul.f32 %v3733_v52, %v1274_v5 }
 0x3e4   :  { %v2529_v29 = vpop.f32.mrb[54].mxu1  ;;  %v2609_v31 = vpop.f32.mrb[54].mxu0  ;;  %3027 = vpow2.f32 %v1724_v24  ;;  %v1692_v32 = vmul.f32 %v3733_v52, %v1514_v23  ;;  %v3770_v9 = vmul.f32 %v3733_v52, %v1269_v28 }
 0x3e5   :  { %v1284_v34 = vadd.f32 %v2529_v29, %v3740_v4  ;;  %v1529_v35 = vadd.f32 %v2609_v31, %v3731_v19  ;;  %v1523_v62 = vpop.f32.mrb[55].mxu0  ;;  %1884 = vadd.xlane.f32.xlu1 %v1690_v12  ;;  %v1278_v14 = vpop.f32.mrb[55].mxu1  ;;  %v1730_v2 = vmul.f32 1.442695, %v1693_v27 }
 0x3e6   :  { %v1524_v15 = vadd.f32 %v3731_v19, %v1523_v62  ;;  %v1279_v38 = vadd.f32 %v3740_v4, %v1278_v14  ;;  %v1728_v39 = vmul.f32 1.442695, %v1692_v32  ;;  %1888 = vadd.xlane.f32.xlu0 %v1692_v32 }
 0x3e7   :  { %3029 = vpow2.f32 %v1730_v2  ;;  %v1695_v20 = vmul.f32 %v3733_v52, %v1529_v35  ;;  %v3774_v10 = vmul.f32 %v3733_v52, %v1284_v34 }
 0x3e8   :  { %3031 = vpow2.f32 %v1728_v39  ;;  %v2532_v44 = vpop.f32.mrb[56].mxu1  ;;  %v2612_v45 = vpop.f32.mrb[56].mxu0  ;;  %v1694_v22 = vmul.f32 %v3733_v52, %v1524_v15  ;;  %v3779_v56 = vmul.f32 %v3733_v52, %v1279_v38  ;;  %v3089_v39 = vld [vmem:[#allocation2 + $0x28] sm:$0xff] }
 0x3e9   :  { %v3022_v46 = vpop.eup %3021  ;;  %v1294_v47 = vadd.f32 %v2532_v44, %v3740_v4  ;;  %v1539_v11 = vadd.f32 %v2612_v45, %v3731_v19  ;;  %v1533_v49 = vpop.f32.mrb[57].mxu0  ;;  %1890 = vadd.xlane.f32.xlu1 %v1693_v27  ;;  %v1734_v51 = vmul.f32 1.442695, %v1695_v20 }
 0x3ea   :  { %v1288_v50 = vpop.f32.mrb[57].mxu1  ;;  %v3024_v54 = vpop.eup %3023  ;;  %v1785_v55 = vmul.f32 %v3085_v30, %v3022_v46  ;;  %v1534_v57 = vadd.f32 %v3731_v19, %v1533_v49  ;;  %v1732_v58 = vmul.f32 1.442695, %v1694_v22  ;;  %1892 = vadd.xlane.f32.xlu0 %v1694_v22 }
 0x3eb   :  { %v1784_v25 = vmul.f32 %v3086_v59, %v3024_v54  ;;  %v1289_v61 = vadd.f32 %v3740_v4, %v1288_v50  ;;  %3033 = vpow2.f32 %v1734_v51  ;;  %v1697_v18 = vmul.f32 %v3733_v52, %v1539_v11 }
 0x3ec   :  { %v1817_v42 = vadd.f32 %v1785_v55, %v1657_v33  ;;  %v3785_v63 = vmul.f32 %v3733_v52, %v1294_v47  ;;  %3035 = vpow2.f32 %v1732_v58  ;;  %v2535_v0 = vpop.f32.mrb[58].mxu1  ;;  %v2615_v1 = vpop.f32.mrb[58].mxu0  ;;  %v1696_v6 = vmul.f32 %v3733_v52, %v1534_v57 }
 0x3ed   :  { %v3026_v37 = vpop.eup %3025  ;;  %v1816_v7 = vadd.f32 %v1784_v25, %v1656_v36  ;;  %v1304_v53 = vadd.f32 %v2535_v0, %v3740_v4  ;;  %v1549_v8 = vadd.f32 %v2615_v1, %v3731_v19  ;;  %v1543_v12 = vpop.f32.mrb[59].mxu0  ;;  %1894 = vadd.xlane.f32.xlu1 %v1695_v20  ;;  %v1738_v16 = vmul.f32 1.442695, %v1697_v18 }
 0x3ee   :  { %v1298_v13 = vpop.f32.mrb[59].mxu1  ;;  %v3028_v48 = vpop.eup %3027  ;;  %1849 = vst [vmem:[#allocation8 + $0x8] sm:$0xff] %v1817_v42  ;;  %v1787_v3 = vmul.f32 %v3087_v17, %v3026_v37  ;;  %v1544_v21 = vadd.f32 %v3731_v19, %v1543_v12  ;;  %v1736_v24 = vmul.f32 1.442695, %v1696_v6  ;;  %1896 = vadd.xlane.f32.xlu0 %v1696_v6  ;;  %v3793_v27 = vmul.f32 %v3733_v52, %v1289_v61 }
 0x3ef   :  { %v1299_v23 = vadd.f32 %v3740_v4, %v1298_v13  ;;  %1848 = vst [vmem:[#allocation8] sm:$0xff] %v1816_v7  ;;  %v1786_v60 = vmul.f32 %v3088_v26, %v3028_v48  ;;  %3037 = vpow2.f32 %v1738_v16  ;;  %v1699_v5 = vmul.f32 %v3733_v52, %v1549_v8 }
 0x3f0   :  { %v1819_v28 = vadd.f32 %v1787_v3, %v1659_v40  ;;  %v3797_v29 = vmul.f32 %v3733_v52, %v1304_v53  ;;  %3039 = vpow2.f32 %v1736_v24  ;;  %v2538_v31 = vpop.f32.mrb[60].mxu1  ;;  %v2618_v32 = vpop.f32.mrb[60].mxu0  ;;  %v1698_v33 = vmul.f32 %v3733_v52, %v1544_v21 }
 0x3f1   :  { %v3030_v34 = vpop.eup %3029  ;;  %v1818_v35 = vadd.f32 %v1786_v60, %v3763_v41  ;;  %v1314_v62 = vadd.f32 %v2538_v31, %v3740_v4  ;;  %v1559_v14 = vadd.f32 %v2618_v32, %v3731_v19  ;;  %v1553_v2 = vpop.f32.mrb[61].mxu0  ;;  %1898 = vadd.xlane.f32.xlu1 %v1697_v18  ;;  %v1742_v15 = vmul.f32 1.442695, %v1699_v5  ;;  %v3090_v41 = vld [vmem:[#allocation2 + $0x20] sm:$0xff]  ;;  %v3091_v18 = vld [vmem:[#allocation2 + $0x38] sm:$0xff] }
 0x3f2   :  { %v1308_v36 = vpop.f32.mrb[61].mxu1  ;;  %v3032_v38 = vpop.eup %3031  ;;  %1851 = vst [vmem:[#allocation8 + $0x18] sm:$0xff] %v1819_v28  ;;  %v1789_v40 = vmul.f32 %v3089_v39, %v3030_v34  ;;  %v3804_v20 = vmul.f32 %v3733_v52, %v1299_v23  ;;  %v1554_v44 = vadd.f32 %v3731_v19, %v1553_v2  ;;  %v1740_v45 = vmul.f32 1.442695, %v1698_v33  ;;  %1900 = vadd.xlane.f32.xlu0 %v1698_v33 }
 0x3f3   :  { %1850 = vst [vmem:[#allocation8 + $0x10] sm:$0xff] %v1818_v35  ;;  %v1788_v22 = vmul.f32 %v3090_v41, %v3032_v38  ;;  %v1309_v46 = vadd.f32 %v3740_v4, %v1308_v36  ;;  %3041 = vpow2.f32 %v1742_v15  ;;  %v1701_v47 = vmul.f32 %v3733_v52, %v1559_v14 }
 0x3f4   :  { %v1821_v11 = vadd.f32 %v1789_v40, %v3767_v43  ;;  %v3811_v49 = vmul.f32 %v3733_v52, %v1314_v62  ;;  %3043 = vpow2.f32 %v1740_v45  ;;  %v2541_v50 = vpop.f32.mrb[62].mxu1  ;;  %v2621_v51 = vpop.f32.mrb[62].mxu0  ;;  %v1700_v54 = vmul.f32 %v3733_v52, %v1554_v44 }
 0x3f5   :  { %v3034_v30 = vpop.eup %3033  ;;  %v1820_v55 = vadd.f32 %v1788_v22, %v3770_v9  ;;  %v1324_v57 = vadd.f32 %v2541_v50, %v3740_v4  ;;  %v1569_v58 = vadd.f32 %v2621_v51, %v3731_v19  ;;  %v1563_v59 = vpop.f32.mrb[63].mxu0  ;;  %1902 = vadd.xlane.f32.xlu1 %v1699_v5  ;;  %v1746_v61 = vmul.f32 1.442695, %v1701_v47  ;;  %v3092_v9 = vld [vmem:[#allocation2 + $0x30] sm:$0xff]  ;;  %v3093_v5 = vld [vmem:[#allocation2 + $0x48] sm:$0xff] }
 0x3f6   :  { %v1318_v25 = vpop.f32.mrb[63].mxu1  ;;  %v3036_v43 = vpop.eup %3035  ;;  %1853 = vst [vmem:[#allocation8 + $0x28] sm:$0xff] %v1821_v11  ;;  %v1791_v42 = vmul.f32 %v3091_v18, %v3034_v30  ;;  %v1564_v0 = vadd.f32 %v3731_v19, %v1563_v59  ;;  %v1744_v6 = vmul.f32 1.442695, %v1700_v54  ;;  %1904 = vadd.xlane.f32.xlu0 %v1700_v54  ;;  %v3820_v7 = vmul.f32 %v3733_v52, %v1309_v46 }
 0x3f7   :  { %v1319_v1 = vadd.f32 %v3740_v4, %v1318_v25  ;;  %1852 = vst [vmem:[#allocation8 + $0x20] sm:$0xff] %v1820_v55  ;;  %v1790_v37 = vmul.f32 %v3092_v9, %v3036_v43  ;;  %3045 = vpow2.f32 %v1746_v61  ;;  %v1703_v53 = vmul.f32 %v3733_v52, %v1569_v58 }
 0x3f8   :  { %v1823_v8 = vadd.f32 %v1791_v42, %v3774_v10  ;;  %v3825_v12 = vmul.f32 %v3733_v52, %v1324_v57  ;;  %3047 = vpow2.f32 %v1744_v6  ;;  %v2544_v13 = vpop.f32.mrb[64].mxu1  ;;  %v2624_v16 = vpop.f32.mrb[64].mxu0  ;;  %v1702_v48 = vmul.f32 %v3733_v52, %v1564_v0 }
 0x3f9   :  { %v3038_v17 = vpop.eup %3037  ;;  %v1822_v3 = vadd.f32 %v1790_v37, %v3779_v56  ;;  %v1334_v21 = vadd.f32 %v2544_v13, %v3740_v4  ;;  %v1579_v23 = vadd.f32 %v2624_v16, %v3731_v19  ;;  %v1573_v24 = vpop.f32.mrb[65].mxu0  ;;  %1906 = vadd.xlane.f32.xlu1 %v1701_v47  ;;  %v1750_v60 = vmul.f32 1.442695, %v1703_v53  ;;  %v3094_v56 = vld [vmem:[#allocation2 + $0x40] sm:$0xff]  ;;  %v3095_v47 = vld [vmem:[#allocation2 + $0x58] sm:$0xff] }
 0x3fa   :  { %v1328_v26 = vpop.f32.mrb[65].mxu1  ;;  %v3040_v10 = vpop.eup %3039  ;;  %1855 = vst [vmem:[#allocation8 + $0x38] sm:$0xff] %v1823_v8  ;;  %v1793_v28 = vmul.f32 %v3093_v5, %v3038_v17  ;;  %v3832_v31 = vmul.f32 %v3733_v52, %v1319_v1  ;;  %v1574_v32 = vadd.f32 %v3731_v19, %v1573_v24  ;;  %v1748_v33 = vmul.f32 1.442695, %v1702_v48  ;;  %1908 = vadd.xlane.f32.xlu0 %v1702_v48 }
 0x3fb   :  { %1854 = vst [vmem:[#allocation8 + $0x30] sm:$0xff] %v1822_v3  ;;  %v1792_v34 = vmul.f32 %v3094_v56, %v3040_v10  ;;  %v1329_v35 = vadd.f32 %v3740_v4, %v1328_v26  ;;  %3049 = vpow2.f32 %v1750_v60  ;;  %v1705_v62 = vmul.f32 %v3733_v52, %v1579_v23 }
 0x3fc   :  { %v1825_v14 = vadd.f32 %v1793_v28, %v3785_v63  ;;  %v3839_v2 = vmul.f32 %v3733_v52, %v1334_v21  ;;  %3051 = vpow2.f32 %v1748_v33  ;;  %v2547_v36 = vpop.f32.mrb[66].mxu1  ;;  %v2627_v15 = vpop.f32.mrb[66].mxu0  ;;  %v1704_v38 = vmul.f32 %v3733_v52, %v1574_v32 }
 0x3fd   :  { %v3042_v39 = vpop.eup %3041  ;;  %v1824_v40 = vadd.f32 %v1792_v34, %v3793_v27  ;;  %v1344_v44 = vadd.f32 %v2547_v36, %v3740_v4  ;;  %v1589_v45 = vadd.f32 %v2627_v15, %v3731_v19  ;;  %v1583_v41 = vpop.f32.mrb[67].mxu0  ;;  %1910 = vadd.xlane.f32.xlu1 %v1703_v53  ;;  %v1754_v46 = vmul.f32 1.442695, %v1705_v62  ;;  %v3096_v27 = vld [vmem:[#allocation2 + $0x50] sm:$0xff]  ;;  %v3097_v53 = vld [vmem:[#allocation2 + $0x68] sm:$0xff] }
 0x3fe   :  { %v1338_v22 = vpop.f32.mrb[67].mxu1  ;;  %v3044_v63 = vpop.eup %3043  ;;  %1857 = vst [vmem:[#allocation8 + $0x48] sm:$0xff] %v1825_v14  ;;  %v1795_v11 = vmul.f32 %v3095_v47, %v3042_v39  ;;  %v1584_v50 = vadd.f32 %v3731_v19, %v1583_v41  ;;  %v1752_v54 = vmul.f32 1.442695, %v1704_v38  ;;  %1912 = vadd.xlane.f32.xlu0 %v1704_v38  ;;  %v3848_v55 = vmul.f32 %v3733_v52, %v1329_v35 }
 0x3ff   :  { %v1339_v51 = vadd.f32 %v3740_v4, %v1338_v22  ;;  %1856 = vst [vmem:[#allocation8 + $0x40] sm:$0xff] %v1824_v40  ;;  %v1794_v30 = vmul.f32 %v3096_v27, %v3044_v63  ;;  %3053 = vpow2.f32 %v1754_v46  ;;  %v1707_v57 = vmul.f32 %v3733_v52, %v1589_v45 }
 0x400   :  { %v1827_v58 = vadd.f32 %v1795_v11, %v3797_v29  ;;  %v3853_v59 = vmul.f32 %v3733_v52, %v1344_v44  ;;  %3055 = vpow2.f32 %v1752_v54  ;;  %v2550_v25 = vpop.f32.mrb[68].mxu1  ;;  %v2630_v61 = vpop.f32.mrb[68].mxu0  ;;  %v1706_v43 = vmul.f32 %v3733_v52, %v1584_v50 }
 0x401   :  { %v3046_v18 = vpop.eup %3045  ;;  %v1826_v42 = vadd.f32 %v1794_v30, %v3804_v20  ;;  %v1354_v0 = vadd.f32 %v2550_v25, %v3740_v4  ;;  %v1599_v1 = vadd.f32 %v2630_v61, %v3731_v19  ;;  %v1593_v6 = vpop.f32.mrb[69].mxu0  ;;  %1914 = vadd.xlane.f32.xlu1 %v1705_v62  ;;  %v1758_v37 = vmul.f32 1.442695, %v1707_v57  ;;  %v3098_v20 = vld [vmem:[#allocation2 + $0x60] sm:$0xff]  ;;  %v3099_v62 = vld [vmem:[#allocation2 + $0x78] sm:$0xff] }
 0x402   :  { %v1348_v9 = vpop.f32.mrb[69].mxu1  ;;  %v3048_v29 = vpop.eup %3047  ;;  %1859 = vst [vmem:[#allocation8 + $0x58] sm:$0xff] %v1827_v58  ;;  %v1797_v8 = vmul.f32 %v3097_v53, %v3046_v18  ;;  %v3860_v13 = vmul.f32 %v3733_v52, %v1339_v51  ;;  %v1594_v16 = vadd.f32 %v3731_v19, %v1593_v6  ;;  %v1756_v48 = vmul.f32 1.442695, %v1706_v43  ;;  %1916 = vadd.xlane.f32.xlu0 %v1706_v43 }
 0x403   :  { %1858 = vst [vmem:[#allocation8 + $0x50] sm:$0xff] %v1826_v42  ;;  %v1796_v17 = vmul.f32 %v3098_v20, %v3048_v29  ;;  %v1349_v3 = vadd.f32 %v3740_v4, %v1348_v9  ;;  %3057 = vpow2.f32 %v1758_v37  ;;  %v1709_v21 = vmul.f32 %v3733_v52, %v1599_v1 }
 0x404   :  { %v1829_v23 = vadd.f32 %v1797_v8, %v3811_v49  ;;  %v3867_v24 = vmul.f32 %v3733_v52, %v1354_v0  ;;  %3059 = vpow2.f32 %v1756_v48  ;;  %v2553_v26 = vpop.f32.mrb[70].mxu1  ;;  %v2633_v60 = vpop.f32.mrb[70].mxu0  ;;  %v1708_v10 = vmul.f32 %v3733_v52, %v1594_v16 }
 0x405   :  { %v3050_v5 = vpop.eup %3049  ;;  %v1828_v28 = vadd.f32 %v1796_v17, %v3820_v7  ;;  %v1364_v32 = vadd.f32 %v2553_v26, %v3740_v4  ;;  %v1609_v33 = vadd.f32 %v2633_v60, %v3731_v19  ;;  %v1603_v56 = vpop.f32.mrb[71].mxu0  ;;  %1918 = vadd.xlane.f32.xlu1 %v1707_v57  ;;  %v1762_v35 = vmul.f32 1.442695, %v1709_v21  ;;  %v3100_v7 = vld [vmem:[#allocation2 + $0x70] sm:$0xff]  ;;  %v3101_v57 = vld [vmem:[#allocation2 + $0x88] sm:$0xff] }
 0x406   :  { %v1358_v34 = vpop.f32.mrb[71].mxu1  ;;  %v3052_v49 = vpop.eup %3051  ;;  %1861 = vst [vmem:[#allocation8 + $0x68] sm:$0xff] %v1829_v23  ;;  %v1799_v14 = vmul.f32 %v3099_v62, %v3050_v5  ;;  %v1604_v36 = vadd.f32 %v3731_v19, %v1603_v56  ;;  %v1760_v38 = vmul.f32 1.442695, %v1708_v10  ;;  %1920 = vadd.xlane.f32.xlu0 %v1708_v10  ;;  %v3876_v40 = vmul.f32 %v3733_v52, %v1349_v3 }
 0x407   :  { %v1359_v15 = vadd.f32 %v3740_v4, %v1358_v34  ;;  %1860 = vst [vmem:[#allocation8 + $0x60] sm:$0xff] %v1828_v28  ;;  %v1798_v39 = vmul.f32 %v3100_v7, %v3052_v49  ;;  %3061 = vpow2.f32 %v1762_v35  ;;  %v1711_v44 = vmul.f32 %v3733_v52, %v1609_v33 }
 0x408   :  { %v1831_v45 = vadd.f32 %v1799_v14, %v3825_v12  ;;  %v3881_v41 = vmul.f32 %v3733_v52, %v1364_v32  ;;  %3063 = vpow2.f32 %v1760_v38  ;;  %v2556_v22 = vpop.f32.mrb[72].mxu1  ;;  %v2636_v46 = vpop.f32.mrb[72].mxu0  ;;  %v1710_v63 = vmul.f32 %v3733_v52, %v1604_v36 }
 0x409   :  { %v3054_v47 = vpop.eup %3053  ;;  %v1830_v11 = vadd.f32 %v1798_v39, %v3832_v31  ;;  %v3886_v50 = vmul.f32 %v3733_v52, %v1359_v15  ;;  %v1619_v51 = vadd.f32 %v2636_v46, %v3731_v19  ;;  %v1613_v54 = vpop.f32.mrb[73].mxu0  ;;  %1922 = vadd.xlane.f32.xlu1 %v1709_v21  ;;  %v1766_v12 = vmul.f32 1.442695, %v1711_v44  ;;  %v3102_v31 = vld [vmem:[#allocation2 + $0x80] sm:$0xff]  ;;  %v3103_v21 = vld [vmem:[#allocation2 + $0x98] sm:$0xff] }
 0x40a   :  { %v1368_v27 = vpop.f32.mrb[73].mxu1  ;;  %v3056_v30 = vpop.eup %3055  ;;  %1863 = vst [vmem:[#allocation8 + $0x78] sm:$0xff] %v1831_v45  ;;  %v1801_v58 = vmul.f32 %v3101_v57, %v3054_v47  ;;  %v1614_v25 = vadd.f32 %v3731_v19, %v1613_v54  ;;  %v1764_v43 = vmul.f32 1.442695, %v1710_v63  ;;  %1924 = vadd.xlane.f32.xlu0 %v1710_v63  ;;  %v3892_v42 = vadd.f32 %v2556_v22, %v3740_v4 }
 0x40b   :  { %v1369_v61 = vadd.f32 %v3740_v4, %v1368_v27  ;;  %1862 = vst [vmem:[#allocation8 + $0x70] sm:$0xff] %v1830_v11  ;;  %v1800_v18 = vmul.f32 %v3102_v31, %v3056_v30  ;;  %3065 = vpow2.f32 %v1766_v12  ;;  %v1713_v0 = vmul.f32 %v3733_v52, %v1619_v51 }
 0x40c   :  { %v1833_v1 = vadd.f32 %v1801_v58, %v3839_v2  ;;  %3067 = vpow2.f32 %v1764_v43  ;;  %v2559_v9 = vpop.f32.mrb[74].mxu1  ;;  %v2639_v37 = vpop.f32.mrb[74].mxu0  ;;  %v1712_v29 = vmul.f32 %v3733_v52, %v1614_v25 }
 0x40d   :  { %v3897_v6 = vmul.f32 %v3733_v52, %v1369_v61  ;;  %v3058_v53 = vpop.eup %3057  ;;  %v1832_v8 = vadd.f32 %v1800_v18, %v3848_v55  ;;  %v1384_v16 = vadd.f32 %v2559_v9, %v3740_v4  ;;  %v1629_v48 = vadd.f32 %v2639_v37, %v3731_v19  ;;  %v1623_v20 = vpop.f32.mrb[75].mxu0  ;;  %1926 = vadd.xlane.f32.xlu1 %v1711_v44  ;;  %v3104_v55 = vld [vmem:[#allocation2 + $0x90] sm:$0xff]  ;;  %v3105_v44 = vld [vmem:[#allocation2 + $0xa8] sm:$0xff] }
 0x40e   :  { %v1378_v17 = vpop.f32.mrb[75].mxu1  ;;  %v1770_v3 = vmul.f32 1.442695, %v1713_v0  ;;  %v3060_v2 = vpop.eup %3059  ;;  %1865 = vst [vmem:[#allocation8 + $0x88] sm:$0xff] %v1833_v1  ;;  %v1803_v23 = vmul.f32 %v3103_v21, %v3058_v53  ;;  %v1624_v26 = vadd.f32 %v3731_v19, %v1623_v20  ;;  %v1768_v10 = vmul.f32 1.442695, %v1712_v29  ;;  %1928 = vadd.xlane.f32.xlu0 %v1712_v29 }
 0x40f   :  { %v1379_v60 = vadd.f32 %v3740_v4, %v1378_v17  ;;  %1864 = vst [vmem:[#allocation8 + $0x80] sm:$0xff] %v1832_v8  ;;  %v1802_v5 = vmul.f32 %v3104_v55, %v3060_v2  ;;  %v3906_v28 = vmul.f32 %v3733_v52, %v1384_v16  ;;  %v1715_v32 = vmul.f32 %v3733_v52, %v1629_v48  ;;  %v3107_v1 = vld [vmem:[#allocation2 + $0xb8] sm:$0xff] }
 0x410   :  { %3069 = vpow2.f32 %v1770_v3  ;;  %v1835_v33 = vadd.f32 %v1803_v23, %v3853_v59  ;;  %v2562_v34 = vpop.f32.mrb[76].mxu1  ;;  %v2642_v35 = vpop.f32.mrb[76].mxu0  ;;  %v1714_v49 = vmul.f32 %v3733_v52, %v1624_v26  ;;  %v1681_v23 = vmul.f32 %v3733_v52, %v3892_v42  ;;  %v3109_v26 = vld [vmem:[#allocation2 + $0xc8] sm:$0xff] }
 0x411   :  { %v3911_v56 = vmul.f32 %v3733_v52, %v1379_v60  ;;  %3071 = vpow2.f32 %v1768_v10  ;;  %v3062_v62 = vpop.eup %3061  ;;  %v1834_v14 = vadd.f32 %v1802_v5, %v3860_v13  ;;  %v1394_v36 = vadd.f32 %v2562_v34, %v3740_v4  ;;  %v1633_v38 = vpop.f32.mrb[77].mxu0  ;;  %1930 = vadd.xlane.f32.xlu1 %v1713_v0  ;;  %v3106_v13 = vld [vmem:[#allocation2 + $0xa0] sm:$0xff]  ;;  %v3111_v34 = vld [vmem:[#allocation2 + $0xd8] sm:$0xff] }
 0x412   :  { %v1639_v15 = vadd.f32 %v2642_v35, %v3731_v19  ;;  %v1388_v7 = vpop.f32.mrb[77].mxu1  ;;  %v1774_v39 = vmul.f32 1.442695, %v1715_v32  ;;  %v3064_v59 = vpop.eup %3063  ;;  %1867 = vst [vmem:[#allocation8 + $0x98] sm:$0xff] %v1835_v33  ;;  %v1805_v45 = vmul.f32 %v3105_v44, %v3062_v62  ;;  %v1634_v22 = vadd.f32 %v3731_v19, %v1633_v38  ;;  %1932 = vadd.xlane.f32.xlu0 %v1714_v49 }
 0x413   :  { %v1389_v46 = vadd.f32 %v3740_v4, %v1388_v7  ;;  %v1772_v63 = vmul.f32 1.442695, %v1714_v49  ;;  %1866 = vst [vmem:[#allocation8 + $0x90] sm:$0xff] %v1834_v14  ;;  %v1804_v47 = vmul.f32 %v3106_v13, %v3064_v59  ;;  %v3920_v11 = vmul.f32 %v3733_v52, %v1394_v36  ;;  %v3114_v7 = vld [vmem:[#allocation2 + $0xe0] sm:$0xff] }
 0x414   :  { %3073 = vpow2.f32 %v1774_v39  ;;  %v1717_v51 = vmul.f32 %v3733_v52, %v1639_v15  ;;  %v1837_v54 = vadd.f32 %v1805_v45, %v3867_v24  ;;  %v2565_v12 = vpop.f32.mrb[78].mxu1  ;;  %v2645_v30 = vpop.f32.mrb[78].mxu0  ;;  %v1716_v57 = vmul.f32 %v3733_v52, %v1634_v22  ;;  %v3113_v15 = vld [vmem:[#allocation2 + $0xe8] sm:$0xff]  ;;  %v3115_v22 = vld [vmem:[#allocation2 + $0xf8] sm:$0xff] }
 0x415   :  { %v3925_v27 = vmul.f32 %v3733_v52, %v1389_v46  ;;  %3075 = vpow2.f32 %v1772_v63  ;;  %v3066_v58 = vpop.eup %3065  ;;  %v1836_v25 = vadd.f32 %v1804_v47, %v3876_v40  ;;  %v1404_v61 = vadd.f32 %v2565_v12, %v3740_v4  ;;  %v1643_v31 = vpop.f32.mrb[79].mxu0  ;;  %1934 = vadd.xlane.f32.xlu1 %v1715_v32  ;;  %v3108_v40 = vld [vmem:[#allocation2 + $0xb0] sm:$0xff] }
 0x416   :  { %v1649_v43 = vadd.f32 %v2645_v30, %v3731_v19  ;;  %v1398_v18 = vpop.f32.mrb[79].mxu1  ;;  %v1778_v0 = vmul.f32 1.442695, %v1717_v51  ;;  %v3068_v24 = vpop.eup %3067  ;;  %1869 = vst [vmem:[#allocation8 + $0xa8] sm:$0xff] %v1837_v54  ;;  %v1807_v9 = vmul.f32 %v3107_v1, %v3066_v58  ;;  %v1644_v37 = vadd.f32 %v3731_v19, %v1643_v31  ;;  %1936 = vadd.xlane.f32.xlu0 %v1716_v57 }
 0x417   :  { %v1399_v29 = vadd.f32 %v3740_v4, %v1398_v18  ;;  %v1776_v53 = vmul.f32 1.442695, %v1716_v57  ;;  %1868 = vst [vmem:[#allocation8 + $0xa0] sm:$0xff] %v1836_v25  ;;  %v1806_v8 = vmul.f32 %v3108_v40, %v3068_v24  ;;  %v1687_v16 = vmul.f32 %v3733_v52, %v1404_v61 }
 0x418   :  { %3077 = vpow2.f32 %v1778_v0  ;;  %v1719_v48 = vmul.f32 %v3733_v52, %v1649_v43  ;;  %v1839_v20 = vadd.f32 %v1807_v9, %v3881_v41  ;;  %v1718_v3 = vmul.f32 %v3733_v52, %v1644_v37  ;;  %v3110_v41 = vld [vmem:[#allocation2 + $0xc0] sm:$0xff] }
 0x419   :  { %v1686_v17 = vmul.f32 %v3733_v52, %v1399_v29  ;;  %3079 = vpow2.f32 %v1776_v53  ;;  %v1838_v4 = vadd.f32 %v1806_v8, %v3886_v50  ;;  %1938 = vadd.xlane.f32.xlu1 %v1717_v51  ;;  %v3112_v52 = vld [vmem:[#allocation2 + $0xd0] sm:$0xff] }
 0x41a   :  { %v3070_v19 = vpop.eup %3069  ;;  %v1782_v2 = vmul.f32 1.442695, %v1719_v48  ;;  %1871 = vst [vmem:[#allocation8 + $0xb8] sm:$0xff] %v1839_v20  ;;  %v1780_v10 = vmul.f32 1.442695, %v1718_v3  ;;  %1940 = vadd.xlane.f32.xlu0 %v1718_v3 }
 0x41b   :  { %v3072_v21 = vpop.eup %3071  ;;  %v1809_v60 = vmul.f32 %v3109_v26, %v3070_v19  ;;  %1870 = vst [vmem:[#allocation8 + $0xb0] sm:$0xff] %v1838_v4 }
 0x41c   :  { %v1808_v55 = vmul.f32 %v3110_v41, %v3072_v21  ;;  %3081 = vpow2.f32 %v1782_v2 }
 0x41d   :  { %v1841_v5 = vadd.f32 %v1809_v60, %v1681_v23  ;;  %3083 = vpow2.f32 %v1780_v10  ;;  %1942 = vadd.xlane.f32.xlu1 %v1719_v48 }
 0x41e   :  { %v3074_v32 = vpop.eup %3073  ;;  %v1840_v50 = vadd.f32 %v1808_v55, %v3897_v6 }
 0x41f   :  { %v3076_v33 = vpop.eup %3075  ;;  %1873 = vst [vmem:[#allocation8 + $0xc8] sm:$0xff] %v1841_v5  ;;  %v1811_v35 = vmul.f32 %v3111_v34, %v3074_v32 }
 0x420   :  { %1872 = vst [vmem:[#allocation8 + $0xc0] sm:$0xff] %v1840_v50  ;;  %v1810_v42 = vmul.f32 %v3112_v52, %v3076_v33 }
 0x421   :  { %v1843_v49 = vadd.f32 %v1811_v35, %v3906_v28  ;;  %v3116_v28 = vld [vmem:[#allocation2 + $0xf0] sm:$0xff] }
 0x422   :  { %v3078_v62 = vpop.eup %3077  ;;  %v1842_v14 = vadd.f32 %v1810_v42, %v3911_v56 }
 0x423   :  { %v3080_v36 = vpop.eup %3079  ;;  %1875 = vst [vmem:[#allocation8 + $0xd8] sm:$0xff] %v1843_v49  ;;  %v1813_v38 = vmul.f32 %v3113_v15, %v3078_v62 }
 0x424   :  { %1874 = vst [vmem:[#allocation8 + $0xd0] sm:$0xff] %v1842_v14  ;;  %v1812_v6 = vmul.f32 %v3114_v7, %v3080_v36 }
 0x425   :  { %v1845_v39 = vadd.f32 %v1813_v38, %v3920_v11 }
 0x426   :  { %v3082_v59 = vpop.eup %3081  ;;  %v1844_v44 = vadd.f32 %v1812_v6, %v3925_v27 }
 0x427   :  { %v3084_v45 = vpop.eup %3083  ;;  %1877 = vst [vmem:[#allocation8 + $0xe8] sm:$0xff] %v1845_v39  ;;  %v1815_v46 = vmul.f32 %v3115_v22, %v3082_v59 }
 0x428   :  { %1876 = vst [vmem:[#allocation8 + $0xe0] sm:$0xff] %v1844_v44  ;;  %v1814_v63 = vmul.f32 %v3116_v28, %v3084_v45 }
 0x429   :  { %v1847_v56 = vadd.f32 %v1815_v46, %v1687_v16 }
 0x42a   :  { %v1846_v13 = vadd.f32 %v1814_v63, %v1686_v17 }
 0x42b   :  { %1879 = vst [vmem:[#allocation8 + $0xf8] sm:$0xff] %v1847_v56 }
 0x42c   :  { %1878 = vst [vmem:[#allocation8 + $0xf0] sm:$0xff] %v1846_v13 }
 0x42d   :  { %3194 = shalt.err (!%p3191_p0)
}
 0x42e   :  { %s3195_s5 = scalar_lea.hbm %s4092_s3, 4096 }
 0x42f   :  { %p3196_p1 = scmp.ne.s32.totalorder %s4092_s3, %s3195_s5  ;;  %p3199_p2 = scmp.lt.u32.totalorder %s3195_s5, %s4092_s3 }
 0x431   :  { %p3201_p3 = pnand %p3199_p2, %p3196_p1 }
 0x433   :  { %3204 = shalt.err (!%p3201_p3)
}
 0x434   :  { %1988 = dma.vmem_to_hbm [thread:$0]  %s1983_s25, 4096, %s4092_s3, [#allocation4], %s3213_s27, %s3213_s27, %s3214_s28   ;;  %vm1944_vm2 = vcmask 7168  }
 0x46a   :  { %v1883_v47 = vpop.xlane.xlu0 %1882 }
 0x46b   :  { %1946 = vst.msk [vmem:[%s4093_s4 + $0x8] sm:$0xff] %vm1944_vm2, %v1883_v47 }
 0x46e   :  { %v1887_v11 = vpop.xlane.xlu1 %1886  ;;  %v1881_v51 = vpop.xlane.xlu0 %1880 }
 0x46f   :  { %1948 = vst.msk [vmem:[%s4093_s4 + $0x18] sm:$0xff] %vm1944_vm2, %v1887_v11  ;;  %1945 = vst.msk [vmem:[%s4093_s4] sm:$0xff] %vm1944_vm2, %v1881_v51 }
 0x472   :  { %v1885_v54 = vpop.xlane.xlu1 %1884 }
 0x473   :  { %1947 = vst.msk [vmem:[%s4093_s4 + $0x10] sm:$0xff] %vm1944_vm2, %v1885_v54  ;;  %v1889_v27 = vpop.xlane.xlu0 %1888 }
 0x474   :  { %1949 = vst.msk [vmem:[%s4093_s4 + $0x20] sm:$0xff] %vm1944_vm2, %v1889_v27 }
 0x476   :  { %v1891_v12 = vpop.xlane.xlu1 %1890 }
 0x477   :  { %1950 = vst.msk [vmem:[%s4093_s4 + $0x28] sm:$0xff] %vm1944_vm2, %v1891_v12  ;;  %v1893_v30 = vpop.xlane.xlu0 %1892 }
 0x478   :  { %1951 = vst.msk [vmem:[%s4093_s4 + $0x30] sm:$0xff] %vm1944_vm2, %v1893_v30 }
 0x47a   :  { %v1895_v57 = vpop.xlane.xlu1 %1894 }
 0x47b   :  { %1952 = vst.msk [vmem:[%s4093_s4 + $0x38] sm:$0xff] %vm1944_vm2, %v1895_v57  ;;  %v1897_v58 = vpop.xlane.xlu0 %1896 }
 0x47c   :  { %1953 = vst.msk [vmem:[%s4093_s4 + $0x40] sm:$0xff] %vm1944_vm2, %v1897_v58 }
 0x47e   :  { %v1899_v25 = vpop.xlane.xlu1 %1898 }
 0x47f   :  { %1954 = vst.msk [vmem:[%s4093_s4 + $0x48] sm:$0xff] %vm1944_vm2, %v1899_v25  ;;  %v1901_v61 = vpop.xlane.xlu0 %1900 }
 0x480   :  { %1955 = vst.msk [vmem:[%s4093_s4 + $0x50] sm:$0xff] %vm1944_vm2, %v1901_v61 }
 0x482   :  { %v1903_v43 = vpop.xlane.xlu1 %1902 }
 0x483   :  { %1956 = vst.msk [vmem:[%s4093_s4 + $0x58] sm:$0xff] %vm1944_vm2, %v1903_v43  ;;  %v1905_v31 = vpop.xlane.xlu0 %1904 }
 0x484   :  { %1957 = vst.msk [vmem:[%s4093_s4 + $0x60] sm:$0xff] %vm1944_vm2, %v1905_v31 }
 0x486   :  { %v1907_v18 = vpop.xlane.xlu1 %1906 }
 0x487   :  { %1958 = vst.msk [vmem:[%s4093_s4 + $0x68] sm:$0xff] %vm1944_vm2, %v1907_v18  ;;  %v1909_v0 = vpop.xlane.xlu0 %1908 }
 0x488   :  { %1959 = vst.msk [vmem:[%s4093_s4 + $0x70] sm:$0xff] %vm1944_vm2, %v1909_v0 }
 0x48a   :  { %v1911_v24 = vpop.xlane.xlu1 %1910 }
 0x48b   :  { %1960 = vst.msk [vmem:[%s4093_s4 + $0x78] sm:$0xff] %vm1944_vm2, %v1911_v24  ;;  %v1913_v1 = vpop.xlane.xlu0 %1912 }
 0x48c   :  { %1961 = vst.msk [vmem:[%s4093_s4 + $0x80] sm:$0xff] %vm1944_vm2, %v1913_v1 }
 0x48e   :  { %v1915_v9 = vpop.xlane.xlu1 %1914 }
 0x48f   :  { %1962 = vst.msk [vmem:[%s4093_s4 + $0x88] sm:$0xff] %vm1944_vm2, %v1915_v9  ;;  %v1917_v37 = vpop.xlane.xlu0 %1916 }
 0x490   :  { %1963 = vst.msk [vmem:[%s4093_s4 + $0x90] sm:$0xff] %vm1944_vm2, %v1917_v37 }
 0x492   :  { %v1919_v29 = vpop.xlane.xlu1 %1918 }
 0x493   :  { %1964 = vst.msk [vmem:[%s4093_s4 + $0x98] sm:$0xff] %vm1944_vm2, %v1919_v29  ;;  %v1921_v53 = vpop.xlane.xlu0 %1920 }
 0x494   :  { %1965 = vst.msk [vmem:[%s4093_s4 + $0xa0] sm:$0xff] %vm1944_vm2, %v1921_v53 }
 0x496   :  { %v1923_v40 = vpop.xlane.xlu1 %1922 }
 0x497   :  { %1966 = vst.msk [vmem:[%s4093_s4 + $0xa8] sm:$0xff] %vm1944_vm2, %v1923_v40  ;;  %v1925_v8 = vpop.xlane.xlu0 %1924 }
 0x498   :  { %1967 = vst.msk [vmem:[%s4093_s4 + $0xb0] sm:$0xff] %vm1944_vm2, %v1925_v8 }
 0x49a   :  { %v1927_v16 = vpop.xlane.xlu1 %1926 }
 0x49b   :  { %1968 = vst.msk [vmem:[%s4093_s4 + $0xb8] sm:$0xff] %vm1944_vm2, %v1927_v16  ;;  %v1929_v48 = vpop.xlane.xlu0 %1928 }
 0x49c   :  { %1969 = vst.msk [vmem:[%s4093_s4 + $0xc0] sm:$0xff] %vm1944_vm2, %v1929_v48 }
 0x49e   :  { %v1931_v20 = vpop.xlane.xlu1 %1930 }
 0x49f   :  { %1970 = vst.msk [vmem:[%s4093_s4 + $0xc8] sm:$0xff] %vm1944_vm2, %v1931_v20  ;;  %v1933_v17 = vpop.xlane.xlu0 %1932 }
 0x4a0   :  { %1971 = vst.msk [vmem:[%s4093_s4 + $0xd0] sm:$0xff] %vm1944_vm2, %v1933_v17 }
 0x4a2   :  { %v1935_v3 = vpop.xlane.xlu1 %1934 }
 0x4a3   :  { %1972 = vst.msk [vmem:[%s4093_s4 + $0xd8] sm:$0xff] %vm1944_vm2, %v1935_v3  ;;  %v1937_v19 = vpop.xlane.xlu0 %1936 }
 0x4a4   :  { %1973 = vst.msk [vmem:[%s4093_s4 + $0xe0] sm:$0xff] %vm1944_vm2, %v1937_v19 }
 0x4a6   :  { %v1939_v4 = vpop.xlane.xlu1 %1938 }
 0x4a7   :  { %1974 = vst.msk [vmem:[%s4093_s4 + $0xe8] sm:$0xff] %vm1944_vm2, %v1939_v4  ;;  %v1941_v2 = vpop.xlane.xlu0 %1940 }
 0x4a8   :  { %1975 = vst.msk [vmem:[%s4093_s4 + $0xf0] sm:$0xff] %vm1944_vm2, %v1941_v2 }
 0x4aa   :  { %v1943_v21 = vpop.xlane.xlu1 %1942 }
 0x4ab   :  { %1976 = vst.msk [vmem:[%s4093_s4 + $0xf8] sm:$0xff] %vm1944_vm2, %v1943_v21 }
 0x4ac   :  { %3209 = dma.done.wait [#allocation4], 4096  }
 0x4ad   :  { %3210 = vsyncadd [#allocation4], 4294963200 }
 0x4ae   :  { %1996 = vsyncpa [#allocation3], 1 }
 0x4af   :  { %1997 = vsyncpa [#allocation6], 1 }
 0x4b0   :  { %1998 = vsyncpa [#allocation4], 1 }

</bundles_post_ra>
